<compile_context>
chip_gen: v6e
topology: v6e:2x2x1
jax: 0.10.0
libtpu: 0.0.40
codegen_flags: <defaults>
</compile_context>

<pallas_src>
import math
import functools

import jax
import jax.numpy as jnp
from jax.experimental import pallas as pl
from jax.experimental.pallas import tpu as pltpu


# dtype fed to the MXU for all matmuls (accumulation stays f32).  bf16 is
# native on v6e/v7x MXUs; switch to jnp.float32 for exact-f32 matmuls.
_MXU_DTYPE = jnp.bfloat16
_MASK_VALUE = -1e30  # finite "-inf": exp() underflows to exactly 0, no NaN risk


# ----------------------------- kernel helpers ------------------------------

def _mm(a, w_t):
    """a:(rows, in) @ w_t:(out, in).T -> (rows, out); bf16 MXU inputs, f32 acc."""
    return jax.lax.dot_general(
        a.astype(_MXU_DTYPE), w_t.astype(_MXU_DTYPE),
        (((1,), (1,)), ((), ())),
        preferred_element_type=jnp.float32)


def _layer_norm(x, g, b, eps=1e-5):
    mu = jnp.mean(x, axis=-1, keepdims=True)
    var = jnp.mean((x - mu) ** 2, axis=-1, keepdims=True)
    return (x - mu) * jax.lax.rsqrt(var + eps) * g + b


# --------------------------------- kernel ----------------------------------

def attention_encoder_kernel(
        x_ref, pe_ref,
        wq_ref, wk_ref, wv_ref, bq_ref, bk_ref, bv_ref,
        wo_ref, bo_ref, w1_ref, b1_ref, w2_ref, b2_ref,
        ln1g_ref, ln1b_ref, ln2g_ref, ln2b_ref,
        fng_ref, fnb_ref,
        o_ref,
        h_scratch,
        *, num_heads, d_model, nb, seq_len):
    layer = pl.program_id(1)
    num_layers = pl.num_programs(1)
    head_dim = d_model // num_heads
    rows = nb * seq_len

    # -- first layer step for this batch block: positional encoding + scaling --
    @pl.when(layer == 0)
    def _init():
        h0 = (x_ref[...] + pe_ref[...][None, :, :]) * math.sqrt(d_model)
        h_scratch[...] = h0.reshape(rows, d_model)

    x = h_scratch[...]                                        # (rows, D), f32

    # ---- multi-head self-attention ----
    # Separate full-width projections; 1/sqrt(head_dim) folded into q once.
    q = (_mm(x, wq_ref[0]) + bq_ref[0]) * (1.0 / math.sqrt(head_dim))
    k = _mm(x, wk_ref[0]) + bk_ref[0]
    v = _mm(x, wv_ref[0]) + bv_ref[0]
    q3 = q.reshape(nb, seq_len, d_model)
    k3 = k.reshape(nb, seq_len, d_model)
    v3 = v.reshape(nb, seq_len, d_model)

    # Causal additive mask built in-kernel (no (S,S) HBM array / DMA).
    row_id = jax.lax.broadcasted_iota(jnp.int32, (seq_len, seq_len), 0)
    col_id = jax.lax.broadcasted_iota(jnp.int32, (seq_len, seq_len), 1)
    causal = jnp.where(row_id >= col_id, 0.0, _MASK_VALUE).astype(jnp.float32)

    head_outs = []
    for h in range(num_heads):                                # small static H
        lo = h * head_dim
        qh = q3[:, :, lo:lo + head_dim]
        kh = k3[:, :, lo:lo + head_dim]
        vh = v3[:, :, lo:lo + head_dim]
        s = jnp.einsum('bqd,bkd->bqk',
                       qh.astype(_MXU_DTYPE), kh.astype(_MXU_DTYPE),
                       preferred_element_type=jnp.float32)    # (nb, S, S)
        s = s + causal[None]
        m = jnp.max(s, axis=-1, keepdims=True)
        e = jnp.exp(s - m)
        p = e * pl.reciprocal(jnp.sum(e, axis=-1, keepdims=True), approx=True)
        head_outs.append(
            jnp.einsum('bqk,bkd->bqd',
                       p.astype(_MXU_DTYPE), vh.astype(_MXU_DTYPE),
                       preferred_element_type=jnp.float32))   # (nb, S, hd)

    attn = jnp.concatenate(head_outs, axis=-1).reshape(rows, d_model)
    attn = _mm(attn, wo_ref[0]) + bo_ref[0]                   # single Wo matmul

    x = _layer_norm(x + attn, ln1g_ref[0], ln1b_ref[0])

    # ---- feed-forward ----
    h1 = jnp.maximum(_mm(x, w1_ref[0]) + b1_ref[0], 0.0)
    h2 = _mm(h1, w2_ref[0]) + b2_ref[0]
    x = _layer_norm(x + h2, ln2g_ref[0], ln2b_ref[0])

    h_scratch[...] = x                                        # carry to next layer

    # -- last layer step: final LayerNorm of nn.TransformerEncoder(norm=...) --
    @pl.when(layer == num_layers - 1)
    def _finalize():
        y = _layer_norm(x, fng_ref[...], fnb_ref[...])
        o_ref[...] = y.reshape(nb, seq_len, d_model)


# --------------------------------- wrapper ---------------------------------

_PARAM_ORDER = ("wq", "wk", "wv", "bq", "bk", "bv", "wo", "bo",
                "w1", "b1", "w2", "b2", "ln1g", "ln1b", "ln2g", "ln2b")


def attention_encoder(x, params, pe, *, num_layers, num_heads, d_model,
                      batch_block=None):
    N, S, D = x.shape
    assert D == d_model and D % num_heads == 0
    nb = N if batch_block is None else batch_block
    assert N % nb == 0

    layer_params = [params[k] for k in _PARAM_ORDER]

    def layer_spec(a):
        # stacked (L, ...) parameter: stream one layer's slice per grid step
        return pl.BlockSpec(
            (1,) + a.shape[1:],
            lambda b, l, nd=a.ndim: (l,) + (0,) * (nd - 1))

    def resident_spec(a):
        return pl.BlockSpec(a.shape, lambda b, l, nd=a.ndim: (0,) * nd)

    in_specs = ([pl.BlockSpec((nb, S, D), lambda b, l: (b, 0, 0)),   # x
                 resident_spec(pe)]
                + [layer_spec(a) for a in layer_params]
                + [resident_spec(params["fng"]), resident_spec(params["fnb"])])

    kernel = functools.partial(attention_encoder_kernel,
                               num_heads=num_heads, d_model=d_model,
                               nb=nb, seq_len=S)

    return pl.pallas_call(
        kernel,
        out_shape=jax.ShapeDtypeStruct((N, S, D), jnp.float32),
        grid_spec=pltpu.PrefetchScalarGridSpec(
            num_scalar_prefetch=0,
            grid=(N // nb, num_layers),   # batch blocks x layers (layers inner)
            in_specs=in_specs,
            out_specs=pl.BlockSpec((nb, S, D), lambda b, l: (b, 0, 0)),
            scratch_shapes=[pltpu.VMEM((nb * S, D), jnp.float32)]),
        compiler_params=pltpu.CompilerParams(
            dimension_semantics=("parallel", "arbitrary")),
    )(x, pe, *layer_params, params["fng"], params["fnb"])


# ---------------------------- pure-JAX reference ---------------------------

def _ln_ref(x, g, b, eps=1e-5):
    mu = jnp.mean(x, axis=-1, keepdims=True)
    var = jnp.mean((x - mu) ** 2, axis=-1, keepdims=True)
    return (x - mu) / jnp.sqrt(var + eps) * g + b


def reference_forward(x, params, pe, *, num_layers, num_heads, d_model,
                      matmul_dtype=None):
    """Pure-JAX reference of the PyTorch module (eval mode).

    matmul_dtype=None      -> exact f32 matmuls (module semantics).
    matmul_dtype=bfloat16  -> simulate the kernel's bf16-operand /
                              f32-accumulate MXU matmuls (rest stays f32).
    """
    N, S, D = x.shape
    hd = D // num_heads

    def cast(a):
        return a if matmul_dtype is None else a.astype(matmul_dtype)

    def ein(expr, a, b):
        return jnp.einsum(expr, cast(a), cast(b),
                          preferred_element_type=jnp.float32,
                          precision=jax.lax.Precision.HIGHEST)

    mask = make_causal_mask(S)
    h = (x + pe[None]) * math.sqrt(d_model)
    for l in range(num_layers):
        q = (ein('nsd,od->nso', h, params["wq"][l]) + params["bq"][l, 0]) / math.sqrt(hd)
        k = ein('nsd,od->nso', h, params["wk"][l]) + params["bk"][l, 0]
        v = ein('nsd,od->nso', h, params["wv"][l]) + params["bv"][l, 0]
        q = q.reshape(N, S, num_heads, hd)
        k = k.reshape(N, S, num_heads, hd)
        v = v.reshape(N, S, num_heads, hd)
        s = ein('nqhd,nkhd->nhqk', q, k) + mask[None, None]
        p = jax.nn.softmax(s, axis=-1)
        o = ein('nhqk,nkhd->nqhd', p, v).reshape(N, S, D)
        o = ein('nsd,od->nso', o, params["wo"][l]) + params["bo"][l, 0]
        h = _ln_ref(h + o, params["ln1g"][l, 0], params["ln1b"][l, 0])
        f = jax.nn.relu(ein('nsd,od->nso', h, params["w1"][l]) + params["b1"][l, 0])
        f = ein('nsf,of->nso', f, params["w2"][l]) + params["b2"][l, 0]
        h = _ln_ref(h + f, params["ln2g"][l, 0], params["ln2b"][l, 0])
    return _ln_ref(h, params["fng"][0], params["fnb"][0])


# ------------------------------ param / PE init ----------------------------

def make_sinusoidal_pe(seq_len, d_model):
    pos = jnp.arange(seq_len, dtype=jnp.float32)[:, None]
    div = jnp.exp(jnp.arange(0, d_model, 2, dtype=jnp.float32) *
                  (-math.log(10000.0) / d_model))
    pe = jnp.zeros((seq_len, d_model), jnp.float32)
    pe = pe.at[:, 0::2].set(jnp.sin(pos * div))
    pe = pe.at[:, 1::2].set(jnp.cos(pos * div))
    return pe


def make_causal_mask(S):
    tril = jnp.tril(jnp.ones((S, S), jnp.bool_))
    return jnp.where(tril, 0.0, float("-inf")).astype(jnp.float32)


def init_params(key, *, num_layers, d_model, ff_dim):
    ks = jax.random.split(key, 12)
    scale = 0.05
    L, D, F = num_layers, d_model, ff_dim
    return {
        "wq": scale * jax.random.normal(ks[0], (L, D, D), jnp.float32),
        "wk": scale * jax.random.normal(ks[1], (L, D, D), jnp.float32),
        "wv": scale * jax.random.normal(ks[2], (L, D, D), jnp.float32),
        "bq": scale * jax.random.normal(ks[3], (L, 1, D), jnp.float32),
        "bk": scale * jax.random.normal(ks[4], (L, 1, D), jnp.float32),
        "bv": scale * jax.random.normal(ks[5], (L, 1, D), jnp.float32),
        "wo": scale * jax.random.normal(ks[6], (L, D, D), jnp.float32),
        "bo": scale * jax.random.normal(ks[7], (L, 1, D), jnp.float32),
        "w1": scale * jax.random.normal(ks[8], (L, F, D), jnp.float32),
        "b1": scale * jax.random.normal(ks[9], (L, 1, F), jnp.float32),
        "w2": scale * jax.random.normal(ks[10], (L, D, F), jnp.float32),
        "b2": scale * jax.random.normal(ks[11], (L, 1, D), jnp.float32),
        "ln1g": jnp.ones((L, 1, D), jnp.float32),
        "ln1b": jnp.zeros((L, 1, D), jnp.float32),
        "ln2g": jnp.ones((L, 1, D), jnp.float32),
        "ln2b": jnp.zeros((L, 1, D), jnp.float32),
        "fng": jnp.ones((1, D), jnp.float32),
        "fnb": jnp.zeros((1, D), jnp.float32),
    }


# ----------------------------------- main -----------------------------------

if __name__ == "__main__":
    # small shapes consistent with the module (d_model divisible by num_heads)
    N, S, D, H, FF, L = 2, 8, 32, 4, 64, 2

    key = jax.random.PRNGKey(0)
    kx, kp = jax.random.split(key)
    x = jax.random.normal(kx, (N, S, D), jnp.float32)

    params = init_params(kp, num_layers=L, d_model=D, ff_dim=FF)
    pe = make_sinusoidal_pe(S, D)

    out = attention_encoder(x, params, pe,
                            num_layers=L, num_heads=H, d_model=D)
    out = jax.block_until_ready(out)
    assert out.shape == (N, S, D)
    assert bool(jnp.all(jnp.isfinite(out)))

    # (a) reference that mirrors the kernel's MXU numerics (bf16 operands,
    #     f32 accumulation) -> tight agreement proves kernel logic.
    ref_mxu = reference_forward(x, params, pe, num_layers=L, num_heads=H,
                                d_model=D, matmul_dtype=jnp.bfloat16)
    ref_mxu = jax.block_until_ready(ref_mxu)
    err_mxu = float(jnp.max(jnp.abs(out - ref_mxu)))
    assert err_mxu < 5e-3, f"kernel vs bf16-matmul reference: {err_mxu}"

    # (b) exact-f32 module reference -> bf16-MXU approximation stays small.
    ref_f32 = reference_forward(x, params, pe, num_layers=L, num_heads=H,
                                d_model=D)
    ref_f32 = jax.block_until_ready(ref_f32)
    err_f32 = float(jnp.max(jnp.abs(out - ref_f32)))
    assert err_f32 < 5e-2, f"kernel vs f32 reference: {err_f32}"

    print("KERNEL_OK")
</pallas_src>

<mosaic_0001>
module attributes {stable_mosaic.version = 11 : i64} {
  func.func @attention_encoder_kernel(%arg0: i32, %arg1: i32, %arg2: memref<2x8x32xf32, #tpu.memory_space<vmem>>, %arg3: memref<8x32xf32, #tpu.memory_space<vmem>>, %arg4: memref<1x32x32xf32, #tpu.memory_space<vmem>>, %arg5: memref<1x32x32xf32, #tpu.memory_space<vmem>>, %arg6: memref<1x32x32xf32, #tpu.memory_space<vmem>>, %arg7: memref<1x1x32xf32, #tpu.memory_space<vmem>>, %arg8: memref<1x1x32xf32, #tpu.memory_space<vmem>>, %arg9: memref<1x1x32xf32, #tpu.memory_space<vmem>>, %arg10: memref<1x32x32xf32, #tpu.memory_space<vmem>>, %arg11: memref<1x1x32xf32, #tpu.memory_space<vmem>>, %arg12: memref<1x64x32xf32, #tpu.memory_space<vmem>>, %arg13: memref<1x1x64xf32, #tpu.memory_space<vmem>>, %arg14: memref<1x32x64xf32, #tpu.memory_space<vmem>>, %arg15: memref<1x1x32xf32, #tpu.memory_space<vmem>>, %arg16: memref<1x1x32xf32, #tpu.memory_space<vmem>>, %arg17: memref<1x1x32xf32, #tpu.memory_space<vmem>>, %arg18: memref<1x1x32xf32, #tpu.memory_space<vmem>>, %arg19: memref<1x1x32xf32, #tpu.memory_space<vmem>>, %arg20: memref<1x32xf32, #tpu.memory_space<vmem>>, %arg21: memref<1x32xf32, #tpu.memory_space<vmem>>, %arg22: memref<2x8x32xf32, #tpu.memory_space<vmem>>, %arg23: memref<16x32xf32, #tpu.memory_space<vmem>>) attributes {dimension_semantics = [#tpu.dimension_semantics<parallel>, #tpu.dimension_semantics<arbitrary>], iteration_bounds = array<i64: 1, 2>, scalar_prefetch = 0 : i64, scratch_operands = 1 : i64, tpu.core_type = #tpu.core_type<tc>, window_params = [{transform_indices = @transform_0, window_bounds = array<i64: 2, 8, 32>}, {pipeline_mode = #tpu.pipeline_mode<synchronous>, transform_indices = @transform_1, window_bounds = array<i64: 8, 32>}, {transform_indices = @transform_2, window_bounds = array<i64: 1, 32, 32>}, {transform_indices = @transform_3, window_bounds = array<i64: 1, 32, 32>}, {transform_indices = @transform_4, window_bounds = array<i64: 1, 32, 32>}, {transform_indices = @transform_5, window_bounds = array<i64: 1, 1, 32>}, {transform_indices = @transform_6, window_bounds = array<i64: 1, 1, 32>}, {transform_indices = @transform_7, window_bounds = array<i64: 1, 1, 32>}, {transform_indices = @transform_8, window_bounds = array<i64: 1, 32, 32>}, {transform_indices = @transform_9, window_bounds = array<i64: 1, 1, 32>}, {transform_indices = @transform_10, window_bounds = array<i64: 1, 64, 32>}, {transform_indices = @transform_11, window_bounds = array<i64: 1, 1, 64>}, {transform_indices = @transform_12, window_bounds = array<i64: 1, 32, 64>}, {transform_indices = @transform_13, window_bounds = array<i64: 1, 1, 32>}, {transform_indices = @transform_14, window_bounds = array<i64: 1, 1, 32>}, {transform_indices = @transform_15, window_bounds = array<i64: 1, 1, 32>}, {transform_indices = @transform_16, window_bounds = array<i64: 1, 1, 32>}, {transform_indices = @transform_17, window_bounds = array<i64: 1, 1, 32>}, {pipeline_mode = #tpu.pipeline_mode<synchronous>, transform_indices = @transform_18, window_bounds = array<i64: 1, 32>}, {pipeline_mode = #tpu.pipeline_mode<synchronous>, transform_indices = @transform_19, window_bounds = array<i64: 1, 32>}, {transform_indices = @transform_20, window_bounds = array<i64: 2, 8, 32>}]} {
    %c0_i32 = arith.constant 0 : i32
    %0 = arith.cmpi eq, %arg1, %c0_i32 : i32
    %1 = arith.extui %0 : i1 to i32
    %c0_i32_0 = arith.constant 0 : i32
    %2 = arith.cmpi ne, %1, %c0_i32_0 : i32
    scf.if %2 {
      %c0_88 = arith.constant 0 : index
      %c0_89 = arith.constant 0 : index
      %c0_90 = arith.constant 0 : index
      %219 = vector.load %arg2[%c0_88, %c0_89, %c0_90] : memref<2x8x32xf32, #tpu.memory_space<vmem>>, vector<2x8x32xf32>
      %c0_91 = arith.constant 0 : index
      %c0_92 = arith.constant 0 : index
      %220 = vector.load %arg3[%c0_91, %c0_92] : memref<8x32xf32, #tpu.memory_space<vmem>>, vector<8x32xf32>
      %221 = vector.shape_cast %220 : vector<8x32xf32> to vector<1x8x32xf32>
      %222 = vector.broadcast %221 : vector<1x8x32xf32> to vector<2x8x32xf32>
      %223 = arith.addf %219, %222 : vector<2x8x32xf32>
      %cst_93 = arith.constant 5.65685415 : f32
      %224 = vector.broadcast %cst_93 : f32 to vector<2x8x32xf32>
      %225 = arith.mulf %223, %224 : vector<2x8x32xf32>
      %226 = vector.shape_cast %225 : vector<2x8x32xf32> to vector<16x32xf32>
      %c0_94 = arith.constant 0 : index
      %c0_95 = arith.constant 0 : index
      %227 = vector.load %arg23[%c0_94, %c0_95] : memref<16x32xf32, #tpu.memory_space<vmem>>, vector<16x32xf32>
      tpu.vector_store %arg23[%c0_94, %c0_95], %226 {strides = array<i32>} : memref<16x32xf32, #tpu.memory_space<vmem>>, vector<16x32xf32>,
    } else {
    }
    %c0 = arith.constant 0 : index
    %c0_1 = arith.constant 0 : index
    %3 = vector.load %arg23[%c0, %c0_1] : memref<16x32xf32, #tpu.memory_space<vmem>>, vector<16x32xf32>
    %c0_2 = arith.constant 0 : index
    %c0_3 = arith.constant 0 : index
    %c0_4 = arith.constant 0 : index
    %4 = vector.load %arg4[%c0_2, %c0_3, %c0_4] : memref<1x32x32xf32, #tpu.memory_space<vmem>>, vector<1x32x32xf32>
    %5 = vector.shape_cast %4 : vector<1x32x32xf32> to vector<32x32xf32>
    %6 = arith.truncf %3 : vector<16x32xf32> to vector<16x32xbf16>
    %7 = arith.truncf %5 : vector<32x32xf32> to vector<32x32xbf16>
    %cst = arith.constant dense<0.000000e+00> : vector<16x32xf32>
    %8 = tpu.matmul %6, %7, %cst {dimension_numbers = #tpu.dot_dimension_numbers<[1], [1], [0], [0], [0, 0, 1, 0], [], []>} : vector<16x32xbf16>, vector<32x32xbf16>, vector<16x32xf32> -> vector<16x32xf32>
    %c0_5 = arith.constant 0 : index
    %c0_6 = arith.constant 0 : index
    %c0_7 = arith.constant 0 : index
    %9 = vector.load %arg7[%c0_5, %c0_6, %c0_7] : memref<1x1x32xf32, #tpu.memory_space<vmem>>, vector<1x1x32xf32>
    %10 = vector.shape_cast %9 : vector<1x1x32xf32> to vector<1x32xf32>
    %11 = vector.broadcast %10 : vector<1x32xf32> to vector<16x32xf32>
    %12 = arith.addf %8, %11 : vector<16x32xf32>
    %cst_8 = arith.constant 0.353553385 : f32
    %13 = vector.broadcast %cst_8 : f32 to vector<16x32xf32>
    %14 = arith.mulf %12, %13 : vector<16x32xf32>
    %c0_9 = arith.constant 0 : index
    %c0_10 = arith.constant 0 : index
    %c0_11 = arith.constant 0 : index
    %15 = vector.load %arg5[%c0_9, %c0_10, %c0_11] : memref<1x32x32xf32, #tpu.memory_space<vmem>>, vector<1x32x32xf32>
    %16 = vector.shape_cast %15 : vector<1x32x32xf32> to vector<32x32xf32>
    %17 = arith.truncf %3 : vector<16x32xf32> to vector<16x32xbf16>
    %18 = arith.truncf %16 : vector<32x32xf32> to vector<32x32xbf16>
    %cst_12 = arith.constant dense<0.000000e+00> : vector<16x32xf32>
    %19 = tpu.matmul %17, %18, %cst_12 {dimension_numbers = #tpu.dot_dimension_numbers<[1], [1], [0], [0], [0, 0, 1, 0], [], []>} : vector<16x32xbf16>, vector<32x32xbf16>, vector<16x32xf32> -> vector<16x32xf32>
    %c0_13 = arith.constant 0 : index
    %c0_14 = arith.constant 0 : index
    %c0_15 = arith.constant 0 : index
    %20 = vector.load %arg8[%c0_13, %c0_14, %c0_15] : memref<1x1x32xf32, #tpu.memory_space<vmem>>, vector<1x1x32xf32>
    %21 = vector.shape_cast %20 : vector<1x1x32xf32> to vector<1x32xf32>
    %22 = vector.broadcast %21 : vector<1x32xf32> to vector<16x32xf32>
    %23 = arith.addf %19, %22 : vector<16x32xf32>
    %c0_16 = arith.constant 0 : index
    %c0_17 = arith.constant 0 : index
    %c0_18 = arith.constant 0 : index
    %24 = vector.load %arg6[%c0_16, %c0_17, %c0_18] : memref<1x32x32xf32, #tpu.memory_space<vmem>>, vector<1x32x32xf32>
    %25 = vector.shape_cast %24 : vector<1x32x32xf32> to vector<32x32xf32>
    %26 = arith.truncf %3 : vector<16x32xf32> to vector<16x32xbf16>
    %27 = arith.truncf %25 : vector<32x32xf32> to vector<32x32xbf16>
    %cst_19 = arith.constant dense<0.000000e+00> : vector<16x32xf32>
    %28 = tpu.matmul %26, %27, %cst_19 {dimension_numbers = #tpu.dot_dimension_numbers<[1], [1], [0], [0], [0, 0, 1, 0], [], []>} : vector<16x32xbf16>, vector<32x32xbf16>, vector<16x32xf32> -> vector<16x32xf32>
    %c0_20 = arith.constant 0 : index
    %c0_21 = arith.constant 0 : index
    %c0_22 = arith.constant 0 : index
    %29 = vector.load %arg9[%c0_20, %c0_21, %c0_22] : memref<1x1x32xf32, #tpu.memory_space<vmem>>, vector<1x1x32xf32>
    %30 = vector.shape_cast %29 : vector<1x1x32xf32> to vector<1x32xf32>
    %31 = vector.broadcast %30 : vector<1x32xf32> to vector<16x32xf32>
    %32 = arith.addf %28, %31 : vector<16x32xf32>
    %33 = vector.shape_cast %14 : vector<16x32xf32> to vector<2x8x32xf32>
    %34 = vector.shape_cast %23 : vector<16x32xf32> to vector<2x8x32xf32>
    %35 = vector.shape_cast %32 : vector<16x32xf32> to vector<2x8x32xf32>
    %36 = tpu.iota {dimensions = array<i32: 0>} : vector<8x8xi32>
    %37 = tpu.iota {dimensions = array<i32: 1>} : vector<8x8xi32>
    %38 = arith.cmpi sge, %36, %37 : vector<8x8xi32>
    %cst_23 = arith.constant 0.000000e+00 : f32
    %cst_24 = arith.constant -1.000000e+30 : f32
    %39 = vector.broadcast %cst_23 : f32 to vector<8x8xf32>
    %40 = vector.broadcast %cst_24 : f32 to vector<8x8xf32>
    %41 = arith.select %38, %39, %40 : vector<8x8xi1>, vector<8x8xf32>
    %42 = vector.extract_strided_slice %33 {offsets = [0, 0, 0], sizes = [2, 8, 8], strides = [1, 1, 1]} : vector<2x8x32xf32> to vector<2x8x8xf32>
    %43 = vector.extract_strided_slice %34 {offsets = [0, 0, 0], sizes = [2, 8, 8], strides = [1, 1, 1]} : vector<2x8x32xf32> to vector<2x8x8xf32>
    %44 = vector.extract_strided_slice %35 {offsets = [0, 0, 0], sizes = [2, 8, 8], strides = [1, 1, 1]} : vector<2x8x32xf32> to vector<2x8x8xf32>
    %45 = arith.truncf %42 : vector<2x8x8xf32> to vector<2x8x8xbf16>
    %46 = arith.truncf %43 : vector<2x8x8xf32> to vector<2x8x8xbf16>
    "tpu.trace_start"() <{level = 10 : i32, message = "bqd,bkd->bqk"}> : () -> ()
    %cst_25 = arith.constant dense<0.000000e+00> : vector<2x8x8xf32>
    %47 = tpu.matmul %45, %46, %cst_25 {dimension_numbers = #tpu.dot_dimension_numbers<[2], [2], [1], [1], [0, 0, 0, 1, 1, 1], [0], [0]>} : vector<2x8x8xbf16>, vector<2x8x8xbf16>, vector<2x8x8xf32> -> vector<2x8x8xf32>
    "tpu.trace_stop"() : () -> ()
    %48 = vector.shape_cast %41 : vector<8x8xf32> to vector<1x8x8xf32>
    %49 = vector.broadcast %48 : vector<1x8x8xf32> to vector<2x8x8xf32>
    %50 = arith.addf %47, %49 : vector<2x8x8xf32>
    %cst_26 = arith.constant dense<0xFF800000> : vector<2x8xf32>
    %51 = vector.multi_reduction <maximumf>, %50, %cst_26 [2] : vector<2x8x8xf32> to vector<2x8xf32>
    %52 = vector.shape_cast %51 : vector<2x8xf32> to vector<2x8x1xf32>
    %53 = vector.broadcast %52 : vector<2x8x1xf32> to vector<2x8x8xf32>
    %54 = arith.subf %50, %53 : vector<2x8x8xf32>
    %55 = math.exp %54 : vector<2x8x8xf32>
    %cst_27 = arith.constant dense<0.000000e+00> : vector<2x8xf32>
    %56 = vector.multi_reduction <add>, %55, %cst_27 [2] : vector<2x8x8xf32> to vector<2x8xf32>
    %57 = vector.shape_cast %56 : vector<2x8xf32> to vector<2x8x1xf32>
    %58 = tpu.reciprocal %57 {approx = true} : vector<2x8x1xf32> -> vector<2x8x1xf32>
    %59 = vector.broadcast %58 : vector<2x8x1xf32> to vector<2x8x8xf32>
    %60 = arith.mulf %55, %59 : vector<2x8x8xf32>
    %61 = arith.truncf %60 : vector<2x8x8xf32> to vector<2x8x8xbf16>
    %62 = arith.truncf %44 : vector<2x8x8xf32> to vector<2x8x8xbf16>
    "tpu.trace_start"() <{level = 10 : i32, message = "bqk,bkd->bqd"}> : () -> ()
    %cst_28 = arith.constant dense<0.000000e+00> : vector<2x8x8xf32>
    %63 = tpu.matmul %61, %62, %cst_28 {dimension_numbers = #tpu.dot_dimension_numbers<[2], [1], [1], [2], [0, 0, 0, 1, 1, 2], [0], [0]>} : vector<2x8x8xbf16>, vector<2x8x8xbf16>, vector<2x8x8xf32> -> vector<2x8x8xf32>
    "tpu.trace_stop"() : () -> ()
    %64 = vector.extract_strided_slice %33 {offsets = [0, 0, 8], sizes = [2, 8, 8], strides = [1, 1, 1]} : vector<2x8x32xf32> to vector<2x8x8xf32>
    %65 = vector.extract_strided_slice %34 {offsets = [0, 0, 8], sizes = [2, 8, 8], strides = [1, 1, 1]} : vector<2x8x32xf32> to vector<2x8x8xf32>
    %66 = vector.extract_strided_slice %35 {offsets = [0, 0, 8], sizes = [2, 8, 8], strides = [1, 1, 1]} : vector<2x8x32xf32> to vector<2x8x8xf32>
    %67 = arith.truncf %64 : vector<2x8x8xf32> to vector<2x8x8xbf16>
    %68 = arith.truncf %65 : vector<2x8x8xf32> to vector<2x8x8xbf16>
    "tpu.trace_start"() <{level = 10 : i32, message = "bqd,bkd->bqk"}> : () -> ()
    %cst_29 = arith.constant dense<0.000000e+00> : vector<2x8x8xf32>
    %69 = tpu.matmul %67, %68, %cst_29 {dimension_numbers = #tpu.dot_dimension_numbers<[2], [2], [1], [1], [0, 0, 0, 1, 1, 1], [0], [0]>} : vector<2x8x8xbf16>, vector<2x8x8xbf16>, vector<2x8x8xf32> -> vector<2x8x8xf32>
    "tpu.trace_stop"() : () -> ()
    %70 = vector.shape_cast %41 : vector<8x8xf32> to vector<1x8x8xf32>
    %71 = vector.broadcast %70 : vector<1x8x8xf32> to vector<2x8x8xf32>
    %72 = arith.addf %69, %71 : vector<2x8x8xf32>
    %cst_30 = arith.constant dense<0xFF800000> : vector<2x8xf32>
    %73 = vector.multi_reduction <maximumf>, %72, %cst_30 [2] : vector<2x8x8xf32> to vector<2x8xf32>
    %74 = vector.shape_cast %73 : vector<2x8xf32> to vector<2x8x1xf32>
    %75 = vector.broadcast %74 : vector<2x8x1xf32> to vector<2x8x8xf32>
    %76 = arith.subf %72, %75 : vector<2x8x8xf32>
    %77 = math.exp %76 : vector<2x8x8xf32>
    %cst_31 = arith.constant dense<0.000000e+00> : vector<2x8xf32>
    %78 = vector.multi_reduction <add>, %77, %cst_31 [2] : vector<2x8x8xf32> to vector<2x8xf32>
    %79 = vector.shape_cast %78 : vector<2x8xf32> to vector<2x8x1xf32>
    %80 = tpu.reciprocal %79 {approx = true} : vector<2x8x1xf32> -> vector<2x8x1xf32>
    %81 = vector.broadcast %80 : vector<2x8x1xf32> to vector<2x8x8xf32>
    %82 = arith.mulf %77, %81 : vector<2x8x8xf32>
    %83 = arith.truncf %82 : vector<2x8x8xf32> to vector<2x8x8xbf16>
    %84 = arith.truncf %66 : vector<2x8x8xf32> to vector<2x8x8xbf16>
    "tpu.trace_start"() <{level = 10 : i32, message = "bqk,bkd->bqd"}> : () -> ()
    %cst_32 = arith.constant dense<0.000000e+00> : vector<2x8x8xf32>
    %85 = tpu.matmul %83, %84, %cst_32 {dimension_numbers = #tpu.dot_dimension_numbers<[2], [1], [1], [2], [0, 0, 0, 1, 1, 2], [0], [0]>} : vector<2x8x8xbf16>, vector<2x8x8xbf16>, vector<2x8x8xf32> -> vector<2x8x8xf32>
    "tpu.trace_stop"() : () -> ()
    %86 = vector.extract_strided_slice %33 {offsets = [0, 0, 16], sizes = [2, 8, 8], strides = [1, 1, 1]} : vector<2x8x32xf32> to vector<2x8x8xf32>
    %87 = vector.extract_strided_slice %34 {offsets = [0, 0, 16], sizes = [2, 8, 8], strides = [1, 1, 1]} : vector<2x8x32xf32> to vector<2x8x8xf32>
    %88 = vector.extract_strided_slice %35 {offsets = [0, 0, 16], sizes = [2, 8, 8], strides = [1, 1, 1]} : vector<2x8x32xf32> to vector<2x8x8xf32>
    %89 = arith.truncf %86 : vector<2x8x8xf32> to vector<2x8x8xbf16>
    %90 = arith.truncf %87 : vector<2x8x8xf32> to vector<2x8x8xbf16>
    "tpu.trace_start"() <{level = 10 : i32, message = "bqd,bkd->bqk"}> : () -> ()
    %cst_33 = arith.constant dense<0.000000e+00> : vector<2x8x8xf32>
    %91 = tpu.matmul %89, %90, %cst_33 {dimension_numbers = #tpu.dot_dimension_numbers<[2], [2], [1], [1], [0, 0, 0, 1, 1, 1], [0], [0]>} : vector<2x8x8xbf16>, vector<2x8x8xbf16>, vector<2x8x8xf32> -> vector<2x8x8xf32>
    "tpu.trace_stop"() : () -> ()
    %92 = vector.shape_cast %41 : vector<8x8xf32> to vector<1x8x8xf32>
    %93 = vector.broadcast %92 : vector<1x8x8xf32> to vector<2x8x8xf32>
    %94 = arith.addf %91, %93 : vector<2x8x8xf32>
    %cst_34 = arith.constant dense<0xFF800000> : vector<2x8xf32>
    %95 = vector.multi_reduction <maximumf>, %94, %cst_34 [2] : vector<2x8x8xf32> to vector<2x8xf32>
    %96 = vector.shape_cast %95 : vector<2x8xf32> to vector<2x8x1xf32>
    %97 = vector.broadcast %96 : vector<2x8x1xf32> to vector<2x8x8xf32>
    %98 = arith.subf %94, %97 : vector<2x8x8xf32>
    %99 = math.exp %98 : vector<2x8x8xf32>
    %cst_35 = arith.constant dense<0.000000e+00> : vector<2x8xf32>
    %100 = vector.multi_reduction <add>, %99, %cst_35 [2] : vector<2x8x8xf32> to vector<2x8xf32>
    %101 = vector.shape_cast %100 : vector<2x8xf32> to vector<2x8x1xf32>
    %102 = tpu.reciprocal %101 {approx = true} : vector<2x8x1xf32> -> vector<2x8x1xf32>
    %103 = vector.broadcast %102 : vector<2x8x1xf32> to vector<2x8x8xf32>
    %104 = arith.mulf %99, %103 : vector<2x8x8xf32>
    %105 = arith.truncf %104 : vector<2x8x8xf32> to vector<2x8x8xbf16>
    %106 = arith.truncf %88 : vector<2x8x8xf32> to vector<2x8x8xbf16>
    "tpu.trace_start"() <{level = 10 : i32, message = "bqk,bkd->bqd"}> : () -> ()
    %cst_36 = arith.constant dense<0.000000e+00> : vector<2x8x8xf32>
    %107 = tpu.matmul %105, %106, %cst_36 {dimension_numbers = #tpu.dot_dimension_numbers<[2], [1], [1], [2], [0, 0, 0, 1, 1, 2], [0], [0]>} : vector<2x8x8xbf16>, vector<2x8x8xbf16>, vector<2x8x8xf32> -> vector<2x8x8xf32>
    "tpu.trace_stop"() : () -> ()
    %108 = vector.extract_strided_slice %33 {offsets = [0, 0, 24], sizes = [2, 8, 8], strides = [1, 1, 1]} : vector<2x8x32xf32> to vector<2x8x8xf32>
    %109 = vector.extract_strided_slice %34 {offsets = [0, 0, 24], sizes = [2, 8, 8], strides = [1, 1, 1]} : vector<2x8x32xf32> to vector<2x8x8xf32>
    %110 = vector.extract_strided_slice %35 {offsets = [0, 0, 24], sizes = [2, 8, 8], strides = [1, 1, 1]} : vector<2x8x32xf32> to vector<2x8x8xf32>
    %111 = arith.truncf %108 : vector<2x8x8xf32> to vector<2x8x8xbf16>
    %112 = arith.truncf %109 : vector<2x8x8xf32> to vector<2x8x8xbf16>
    "tpu.trace_start"() <{level = 10 : i32, message = "bqd,bkd->bqk"}> : () -> ()
    %cst_37 = arith.constant dense<0.000000e+00> : vector<2x8x8xf32>
    %113 = tpu.matmul %111, %112, %cst_37 {dimension_numbers = #tpu.dot_dimension_numbers<[2], [2], [1], [1], [0, 0, 0, 1, 1, 1], [0], [0]>} : vector<2x8x8xbf16>, vector<2x8x8xbf16>, vector<2x8x8xf32> -> vector<2x8x8xf32>
    "tpu.trace_stop"() : () -> ()
    %114 = vector.shape_cast %41 : vector<8x8xf32> to vector<1x8x8xf32>
    %115 = vector.broadcast %114 : vector<1x8x8xf32> to vector<2x8x8xf32>
    %116 = arith.addf %113, %115 : vector<2x8x8xf32>
    %cst_38 = arith.constant dense<0xFF800000> : vector<2x8xf32>
    %117 = vector.multi_reduction <maximumf>, %116, %cst_38 [2] : vector<2x8x8xf32> to vector<2x8xf32>
    %118 = vector.shape_cast %117 : vector<2x8xf32> to vector<2x8x1xf32>
    %119 = vector.broadcast %118 : vector<2x8x1xf32> to vector<2x8x8xf32>
    %120 = arith.subf %116, %119 : vector<2x8x8xf32>
    %121 = math.exp %120 : vector<2x8x8xf32>
    %cst_39 = arith.constant dense<0.000000e+00> : vector<2x8xf32>
    %122 = vector.multi_reduction <add>, %121, %cst_39 [2] : vector<2x8x8xf32> to vector<2x8xf32>
    %123 = vector.shape_cast %122 : vector<2x8xf32> to vector<2x8x1xf32>
    %124 = tpu.reciprocal %123 {approx = true} : vector<2x8x1xf32> -> vector<2x8x1xf32>
    %125 = vector.broadcast %124 : vector<2x8x1xf32> to vector<2x8x8xf32>
    %126 = arith.mulf %121, %125 : vector<2x8x8xf32>
    %127 = arith.truncf %126 : vector<2x8x8xf32> to vector<2x8x8xbf16>
    %128 = arith.truncf %110 : vector<2x8x8xf32> to vector<2x8x8xbf16>
    "tpu.trace_start"() <{level = 10 : i32, message = "bqk,bkd->bqd"}> : () -> ()
    %cst_40 = arith.constant dense<0.000000e+00> : vector<2x8x8xf32>
    %129 = tpu.matmul %127, %128, %cst_40 {dimension_numbers = #tpu.dot_dimension_numbers<[2], [1], [1], [2], [0, 0, 0, 1, 1, 2], [0], [0]>} : vector<2x8x8xbf16>, vector<2x8x8xbf16>, vector<2x8x8xf32> -> vector<2x8x8xf32>
    "tpu.trace_stop"() : () -> ()
    %130 = tpu.concatenate %63, %85, %107, %129 in 2 : vector<2x8x8xf32>, vector<2x8x8xf32>, vector<2x8x8xf32>, vector<2x8x8xf32> -> vector<2x8x32xf32>
    %131 = vector.shape_cast %130 : vector<2x8x32xf32> to vector<16x32xf32>
    %c0_41 = arith.constant 0 : index
    %c0_42 = arith.constant 0 : index
    %c0_43 = arith.constant 0 : index
    %132 = vector.load %arg10[%c0_41, %c0_42, %c0_43] : memref<1x32x32xf32, #tpu.memory_space<vmem>>, vector<1x32x32xf32>
    %133 = vector.shape_cast %132 : vector<1x32x32xf32> to vector<32x32xf32>
    %134 = arith.truncf %131 : vector<16x32xf32> to vector<16x32xbf16>
    %135 = arith.truncf %133 : vector<32x32xf32> to vector<32x32xbf16>
    %cst_44 = arith.constant dense<0.000000e+00> : vector<16x32xf32>
    %136 = tpu.matmul %134, %135, %cst_44 {dimension_numbers = #tpu.dot_dimension_numbers<[1], [1], [0], [0], [0, 0, 1, 0], [], []>} : vector<16x32xbf16>, vector<32x32xbf16>, vector<16x32xf32> -> vector<16x32xf32>
    %c0_45 = arith.constant 0 : index
    %c0_46 = arith.constant 0 : index
    %c0_47 = arith.constant 0 : index
    %137 = vector.load %arg11[%c0_45, %c0_46, %c0_47] : memref<1x1x32xf32, #tpu.memory_space<vmem>>, vector<1x1x32xf32>
    %138 = vector.shape_cast %137 : vector<1x1x32xf32> to vector<1x32xf32>
    %139 = vector.broadcast %138 : vector<1x32xf32> to vector<16x32xf32>
    %140 = arith.addf %136, %139 : vector<16x32xf32>
    %141 = arith.addf %3, %140 : vector<16x32xf32>
    %c0_48 = arith.constant 0 : index
    %c0_49 = arith.constant 0 : index
    %c0_50 = arith.constant 0 : index
    %142 = vector.load %arg16[%c0_48, %c0_49, %c0_50] : memref<1x1x32xf32, #tpu.memory_space<vmem>>, vector<1x1x32xf32>
    %143 = vector.shape_cast %142 : vector<1x1x32xf32> to vector<1x32xf32>
    %c0_51 = arith.constant 0 : index
    %c0_52 = arith.constant 0 : index
    %c0_53 = arith.constant 0 : index
    %144 = vector.load %arg17[%c0_51, %c0_52, %c0_53] : memref<1x1x32xf32, #tpu.memory_space<vmem>>, vector<1x1x32xf32>
    %145 = vector.shape_cast %144 : vector<1x1x32xf32> to vector<1x32xf32>
    %cst_54 = arith.constant dense<0.000000e+00> : vector<16xf32>
    %146 = vector.multi_reduction <add>, %141, %cst_54 [1] : vector<16x32xf32> to vector<16xf32>
    %147 = vector.shape_cast %146 : vector<16xf32> to vector<16x1xf32>
    %cst_55 = arith.constant 3.200000e+01 : f32
    %148 = vector.broadcast %cst_55 : f32 to vector<16x1xf32>
    %149 = arith.divf %147, %148 : vector<16x1xf32>
    %150 = vector.broadcast %149 : vector<16x1xf32> to vector<16x32xf32>
    %151 = arith.subf %141, %150 : vector<16x32xf32>
    %152 = arith.mulf %151, %151 : vector<16x32xf32>
    %cst_56 = arith.constant dense<0.000000e+00> : vector<16xf32>
    %153 = vector.multi_reduction <add>, %152, %cst_56 [1] : vector<16x32xf32> to vector<16xf32>
    %154 = vector.shape_cast %153 : vector<16xf32> to vector<16x1xf32>
    %cst_57 = arith.constant 3.200000e+01 : f32
    %155 = vector.broadcast %cst_57 : f32 to vector<16x1xf32>
    %156 = arith.divf %154, %155 : vector<16x1xf32>
    %157 = vector.broadcast %149 : vector<16x1xf32> to vector<16x32xf32>
    %158 = arith.subf %141, %157 : vector<16x32xf32>
    %cst_58 = arith.constant 9.99999974E-6 : f32
    %159 = vector.broadcast %cst_58 : f32 to vector<16x1xf32>
    %160 = arith.addf %156, %159 : vector<16x1xf32>
    %161 = math.rsqrt %160 : vector<16x1xf32>
    %162 = vector.broadcast %161 : vector<16x1xf32> to vector<16x32xf32>
    %163 = arith.mulf %158, %162 : vector<16x32xf32>
    %164 = vector.broadcast %143 : vector<1x32xf32> to vector<16x32xf32>
    %165 = arith.mulf %163, %164 : vector<16x32xf32>
    %166 = vector.broadcast %145 : vector<1x32xf32> to vector<16x32xf32>
    %167 = arith.addf %165, %166 : vector<16x32xf32>
    %c0_59 = arith.constant 0 : index
    %c0_60 = arith.constant 0 : index
    %c0_61 = arith.constant 0 : index
    %168 = vector.load %arg12[%c0_59, %c0_60, %c0_61] : memref<1x64x32xf32, #tpu.memory_space<vmem>>, vector<1x64x32xf32>
    %169 = vector.shape_cast %168 : vector<1x64x32xf32> to vector<64x32xf32>
    %170 = arith.truncf %167 : vector<16x32xf32> to vector<16x32xbf16>
    %171 = arith.truncf %169 : vector<64x32xf32> to vector<64x32xbf16>
    %cst_62 = arith.constant dense<0.000000e+00> : vector<16x64xf32>
    %172 = tpu.matmul %170, %171, %cst_62 {dimension_numbers = #tpu.dot_dimension_numbers<[1], [1], [0], [0], [0, 0, 1, 0], [], []>} : vector<16x32xbf16>, vector<64x32xbf16>, vector<16x64xf32> -> vector<16x64xf32>
    %c0_63 = arith.constant 0 : index
    %c0_64 = arith.constant 0 : index
    %c0_65 = arith.constant 0 : index
    %173 = vector.load %arg13[%c0_63, %c0_64, %c0_65] : memref<1x1x64xf32, #tpu.memory_space<vmem>>, vector<1x1x64xf32>
    %174 = vector.shape_cast %173 : vector<1x1x64xf32> to vector<1x64xf32>
    %175 = vector.broadcast %174 : vector<1x64xf32> to vector<16x64xf32>
    %176 = arith.addf %172, %175 : vector<16x64xf32>
    %cst_66 = arith.constant 0.000000e+00 : f32
    %177 = vector.broadcast %cst_66 : f32 to vector<16x64xf32>
    %178 = arith.maximumf %176, %177 : vector<16x64xf32>
    %c0_67 = arith.constant 0 : index
    %c0_68 = arith.constant 0 : index
    %c0_69 = arith.constant 0 : index
    %179 = vector.load %arg14[%c0_67, %c0_68, %c0_69] : memref<1x32x64xf32, #tpu.memory_space<vmem>>, vector<1x32x64xf32>
    %180 = vector.shape_cast %179 : vector<1x32x64xf32> to vector<32x64xf32>
    %181 = arith.truncf %178 : vector<16x64xf32> to vector<16x64xbf16>
    %182 = arith.truncf %180 : vector<32x64xf32> to vector<32x64xbf16>
    %cst_70 = arith.constant dense<0.000000e+00> : vector<16x32xf32>
    %183 = tpu.matmul %181, %182, %cst_70 {dimension_numbers = #tpu.dot_dimension_numbers<[1], [1], [0], [0], [0, 0, 1, 0], [], []>} : vector<16x64xbf16>, vector<32x64xbf16>, vector<16x32xf32> -> vector<16x32xf32>
    %c0_71 = arith.constant 0 : index
    %c0_72 = arith.constant 0 : index
    %c0_73 = arith.constant 0 : index
    %184 = vector.load %arg15[%c0_71, %c0_72, %c0_73] : memref<1x1x32xf32, #tpu.memory_space<vmem>>, vector<1x1x32xf32>
    %185 = vector.shape_cast %184 : vector<1x1x32xf32> to vector<1x32xf32>
    %186 = vector.broadcast %185 : vector<1x32xf32> to vector<16x32xf32>
    %187 = arith.addf %183, %186 : vector<16x32xf32>
    %188 = arith.addf %167, %187 : vector<16x32xf32>
    %c0_74 = arith.constant 0 : index
    %c0_75 = arith.constant 0 : index
    %c0_76 = arith.constant 0 : index
    %189 = vector.load %arg18[%c0_74, %c0_75, %c0_76] : memref<1x1x32xf32, #tpu.memory_space<vmem>>, vector<1x1x32xf32>
    %190 = vector.shape_cast %189 : vector<1x1x32xf32> to vector<1x32xf32>
    %c0_77 = arith.constant 0 : index
    %c0_78 = arith.constant 0 : index
    %c0_79 = arith.constant 0 : index
    %191 = vector.load %arg19[%c0_77, %c0_78, %c0_79] : memref<1x1x32xf32, #tpu.memory_space<vmem>>, vector<1x1x32xf32>
    %192 = vector.shape_cast %191 : vector<1x1x32xf32> to vector<1x32xf32>
    %cst_80 = arith.constant dense<0.000000e+00> : vector<16xf32>
    %193 = vector.multi_reduction <add>, %188, %cst_80 [1] : vector<16x32xf32> to vector<16xf32>
    %194 = vector.shape_cast %193 : vector<16xf32> to vector<16x1xf32>
    %cst_81 = arith.constant 3.200000e+01 : f32
    %195 = vector.broadcast %cst_81 : f32 to vector<16x1xf32>
    %196 = arith.divf %194, %195 : vector<16x1xf32>
    %197 = vector.broadcast %196 : vector<16x1xf32> to vector<16x32xf32>
    %198 = arith.subf %188, %197 : vector<16x32xf32>
    %199 = arith.mulf %198, %198 : vector<16x32xf32>
    %cst_82 = arith.constant dense<0.000000e+00> : vector<16xf32>
    %200 = vector.multi_reduction <add>, %199, %cst_82 [1] : vector<16x32xf32> to vector<16xf32>
    %201 = vector.shape_cast %200 : vector<16xf32> to vector<16x1xf32>
    %cst_83 = arith.constant 3.200000e+01 : f32
    %202 = vector.broadcast %cst_83 : f32 to vector<16x1xf32>
    %203 = arith.divf %201, %202 : vector<16x1xf32>
    %204 = vector.broadcast %196 : vector<16x1xf32> to vector<16x32xf32>
    %205 = arith.subf %188, %204 : vector<16x32xf32>
    %cst_84 = arith.constant 9.99999974E-6 : f32
    %206 = vector.broadcast %cst_84 : f32 to vector<16x1xf32>
    %207 = arith.addf %203, %206 : vector<16x1xf32>
    %208 = math.rsqrt %207 : vector<16x1xf32>
    %209 = vector.broadcast %208 : vector<16x1xf32> to vector<16x32xf32>
    %210 = arith.mulf %205, %209 : vector<16x32xf32>
    %211 = vector.broadcast %190 : vector<1x32xf32> to vector<16x32xf32>
    %212 = arith.mulf %210, %211 : vector<16x32xf32>
    %213 = vector.broadcast %192 : vector<1x32xf32> to vector<16x32xf32>
    %214 = arith.addf %212, %213 : vector<16x32xf32>
    %c0_85 = arith.constant 0 : index
    %c0_86 = arith.constant 0 : index
    %215 = vector.load %arg23[%c0_85, %c0_86] : memref<16x32xf32, #tpu.memory_space<vmem>>, vector<16x32xf32>
    tpu.vector_store %arg23[%c0_85, %c0_86], %214 {strides = array<i32>} : memref<16x32xf32, #tpu.memory_space<vmem>>, vector<16x32xf32>,
    %c1_i32 = arith.constant 1 : i32
    %216 = arith.cmpi eq, %arg1, %c1_i32 : i32
    %217 = arith.extui %216 : i1 to i32
    %c0_i32_87 = arith.constant 0 : i32
    %218 = arith.cmpi ne, %217, %c0_i32_87 : i32
    scf.if %218 {
      %c0_88 = arith.constant 0 : index
      %c0_89 = arith.constant 0 : index
      %219 = vector.load %arg20[%c0_88, %c0_89] : memref<1x32xf32, #tpu.memory_space<vmem>>, vector<1x32xf32>
      %c0_90 = arith.constant 0 : index
      %c0_91 = arith.constant 0 : index
      %220 = vector.load %arg21[%c0_90, %c0_91] : memref<1x32xf32, #tpu.memory_space<vmem>>, vector<1x32xf32>
      %cst_92 = arith.constant dense<0.000000e+00> : vector<16xf32>
      %221 = vector.multi_reduction <add>, %214, %cst_92 [1] : vector<16x32xf32> to vector<16xf32>
      %222 = vector.shape_cast %221 : vector<16xf32> to vector<16x1xf32>
      %cst_93 = arith.constant 3.200000e+01 : f32
      %223 = vector.broadcast %cst_93 : f32 to vector<16x1xf32>
      %224 = arith.divf %222, %223 : vector<16x1xf32>
      %225 = vector.broadcast %224 : vector<16x1xf32> to vector<16x32xf32>
      %226 = arith.subf %214, %225 : vector<16x32xf32>
      %227 = arith.mulf %226, %226 : vector<16x32xf32>
      %cst_94 = arith.constant dense<0.000000e+00> : vector<16xf32>
      %228 = vector.multi_reduction <add>, %227, %cst_94 [1] : vector<16x32xf32> to vector<16xf32>
      %229 = vector.shape_cast %228 : vector<16xf32> to vector<16x1xf32>
      %cst_95 = arith.constant 3.200000e+01 : f32
      %230 = vector.broadcast %cst_95 : f32 to vector<16x1xf32>
      %231 = arith.divf %229, %230 : vector<16x1xf32>
      %232 = vector.broadcast %224 : vector<16x1xf32> to vector<16x32xf32>
      %233 = arith.subf %214, %232 : vector<16x32xf32>
      %cst_96 = arith.constant 9.99999974E-6 : f32
      %234 = vector.broadcast %cst_96 : f32 to vector<16x1xf32>
      %235 = arith.addf %231, %234 : vector<16x1xf32>
      %236 = math.rsqrt %235 : vector<16x1xf32>
      %237 = vector.broadcast %236 : vector<16x1xf32> to vector<16x32xf32>
      %238 = arith.mulf %233, %237 : vector<16x32xf32>
      %239 = vector.broadcast %219 : vector<1x32xf32> to vector<16x32xf32>
      %240 = arith.mulf %238, %239 : vector<16x32xf32>
      %241 = vector.broadcast %220 : vector<1x32xf32> to vector<16x32xf32>
      %242 = arith.addf %240, %241 : vector<16x32xf32>
      %243 = vector.shape_cast %242 : vector<16x32xf32> to vector<2x8x32xf32>
      %c0_97 = arith.constant 0 : index
      %c0_98 = arith.constant 0 : index
      %c0_99 = arith.constant 0 : index
      %244 = vector.load %arg22[%c0_97, %c0_98, %c0_99] : memref<2x8x32xf32, #tpu.memory_space<vmem>>, vector<2x8x32xf32>
      tpu.vector_store %arg22[%c0_97, %c0_98, %c0_99], %243 {strides = array<i32>} : memref<2x8x32xf32, #tpu.memory_space<vmem>>, vector<2x8x32xf32>,
    } else {
    }
    return
  }
  func.func @transform_0(%arg0: i32, %arg1: i32) -> (i32, i32, i32) {
    %c0_i32 = arith.constant 0 : i32
    %c0_i32_0 = arith.constant 0 : i32
    %c0_i32_1 = arith.constant 0 : i32
    return %arg0, %c0_i32, %c0_i32_0 : i32, i32, i32
  }
  func.func @transform_1(%arg0: i32, %arg1: i32) -> (i32, i32) {
    %c0_i32 = arith.constant 0 : i32
    %c0_i32_0 = arith.constant 0 : i32
    %c0_i32_1 = arith.constant 0 : i32
    return %c0_i32, %c0_i32_0 : i32, i32
  }
  func.func @transform_2(%arg0: i32, %arg1: i32) -> (i32, i32, i32) {
    %c0_i32 = arith.constant 0 : i32
    %c0_i32_0 = arith.constant 0 : i32
    %c0_i32_1 = arith.constant 0 : i32
    return %arg1, %c0_i32, %c0_i32_0 : i32, i32, i32
  }
  func.func @transform_3(%arg0: i32, %arg1: i32) -> (i32, i32, i32) {
    %c0_i32 = arith.constant 0 : i32
    %c0_i32_0 = arith.constant 0 : i32
    %c0_i32_1 = arith.constant 0 : i32
    return %arg1, %c0_i32, %c0_i32_0 : i32, i32, i32
  }
  func.func @transform_4(%arg0: i32, %arg1: i32) -> (i32, i32, i32) {
    %c0_i32 = arith.constant 0 : i32
    %c0_i32_0 = arith.constant 0 : i32
    %c0_i32_1 = arith.constant 0 : i32
    return %arg1, %c0_i32, %c0_i32_0 : i32, i32, i32
  }
  func.func @transform_5(%arg0: i32, %arg1: i32) -> (i32, i32, i32) {
    %c0_i32 = arith.constant 0 : i32
    %c0_i32_0 = arith.constant 0 : i32
    %c0_i32_1 = arith.constant 0 : i32
    return %arg1, %c0_i32, %c0_i32_0 : i32, i32, i32
  }
  func.func @transform_6(%arg0: i32, %arg1: i32) -> (i32, i32, i32) {
    %c0_i32 = arith.constant 0 : i32
    %c0_i32_0 = arith.constant 0 : i32
    %c0_i32_1 = arith.constant 0 : i32
    return %arg1, %c0_i32, %c0_i32_0 : i32, i32, i32
  }
  func.func @transform_7(%arg0: i32, %arg1: i32) -> (i32, i32, i32) {
    %c0_i32 = arith.constant 0 : i32
    %c0_i32_0 = arith.constant 0 : i32
    %c0_i32_1 = arith.constant 0 : i32
    return %arg1, %c0_i32, %c0_i32_0 : i32, i32, i32
  }
  func.func @transform_8(%arg0: i32, %arg1: i32) -> (i32, i32, i32) {
    %c0_i32 = arith.constant 0 : i32
    %c0_i32_0 = arith.constant 0 : i32
    %c0_i32_1 = arith.constant 0 : i32
    return %arg1, %c0_i32, %c0_i32_0 : i32, i32, i32
  }
  func.func @transform_9(%arg0: i32, %arg1: i32) -> (i32, i32, i32) {
    %c0_i32 = arith.constant 0 : i32
    %c0_i32_0 = arith.constant 0 : i32
    %c0_i32_1 = arith.constant 0 : i32
    return %arg1, %c0_i32, %c0_i32_0 : i32, i32, i32
  }
  func.func @transform_10(%arg0: i32, %arg1: i32) -> (i32, i32, i32) {
    %c0_i32 = arith.constant 0 : i32
    %c0_i32_0 = arith.constant 0 : i32
    %c0_i32_1 = arith.constant 0 : i32
    return %arg1, %c0_i32, %c0_i32_0 : i32, i32, i32
  }
  func.func @transform_11(%arg0: i32, %arg1: i32) -> (i32, i32, i32) {
    %c0_i32 = arith.constant 0 : i32
    %c0_i32_0 = arith.constant 0 : i32
    %c0_i32_1 = arith.constant 0 : i32
    return %arg1, %c0_i32, %c0_i32_0 : i32, i32, i32
  }
  func.func @transform_12(%arg0: i32, %arg1: i32) -> (i32, i32, i32) {
    %c0_i32 = arith.constant 0 : i32
    %c0_i32_0 = arith.constant 0 : i32
    %c0_i32_1 = arith.constant 0 : i32
    return %arg1, %c0_i32, %c0_i32_0 : i32, i32, i32
  }
  func.func @transform_13(%arg0: i32, %arg1: i32) -> (i32, i32, i32) {
    %c0_i32 = arith.constant 0 : i32
    %c0_i32_0 = arith.constant 0 : i32
    %c0_i32_1 = arith.constant 0 : i32
    return %arg1, %c0_i32, %c0_i32_0 : i32, i32, i32
  }
  func.func @transform_14(%arg0: i32, %arg1: i32) -> (i32, i32, i32) {
    %c0_i32 = arith.constant 0 : i32
    %c0_i32_0 = arith.constant 0 : i32
    %c0_i32_1 = arith.constant 0 : i32
    return %arg1, %c0_i32, %c0_i32_0 : i32, i32, i32
  }
  func.func @transform_15(%arg0: i32, %arg1: i32) -> (i32, i32, i32) {
    %c0_i32 = arith.constant 0 : i32
    %c0_i32_0 = arith.constant 0 : i32
    %c0_i32_1 = arith.constant 0 : i32
    return %arg1, %c0_i32, %c0_i32_0 : i32, i32, i32
  }
  func.func @transform_16(%arg0: i32, %arg1: i32) -> (i32, i32, i32) {
    %c0_i32 = arith.constant 0 : i32
    %c0_i32_0 = arith.constant 0 : i32
    %c0_i32_1 = arith.constant 0 : i32
    return %arg1, %c0_i32, %c0_i32_0 : i32, i32, i32
  }
  func.func @transform_17(%arg0: i32, %arg1: i32) -> (i32, i32, i32) {
    %c0_i32 = arith.constant 0 : i32
    %c0_i32_0 = arith.constant 0 : i32
    %c0_i32_1 = arith.constant 0 : i32
    return %arg1, %c0_i32, %c0_i32_0 : i32, i32, i32
  }
  func.func @transform_18(%arg0: i32, %arg1: i32) -> (i32, i32) {
    %c0_i32 = arith.constant 0 : i32
    %c0_i32_0 = arith.constant 0 : i32
    %c0_i32_1 = arith.constant 0 : i32
    return %c0_i32, %c0_i32_0 : i32, i32
  }
  func.func @transform_19(%arg0: i32, %arg1: i32) -> (i32, i32) {
    %c0_i32 = arith.constant 0 : i32
    %c0_i32_0 = arith.constant 0 : i32
    %c0_i32_1 = arith.constant 0 : i32
    return %c0_i32, %c0_i32_0 : i32, i32
  }
  func.func @transform_20(%arg0: i32, %arg1: i32) -> (i32, i32, i32) {
    %c0_i32 = arith.constant 0 : i32
    %c0_i32_0 = arith.constant 0 : i32
    %c0_i32_1 = arith.constant 0 : i32
    return %arg0, %c0_i32, %c0_i32_0 : i32, i32, i32
  }
}

</mosaic_0001>

<bundles_post_ra>
// kernel: tpu_custom_call.1
= control target key start
LH: loop header
LB: loop body
LE: loop exit
PB: predicated region body
PF: predicated region fallthrough
CT: control target
= control target key end

     0   :  { %s4002_s0 = inlined_call_operand.hbm [shape: f32[2,8,32], index: 0, kind: input, shape index: {}]   ;;  %s4003_s1 = inlined_call_operand.hbm [shape: f32[8,32], index: 1, kind: input, shape index: {}]   ;;  %s4004_s2 = inlined_call_operand.vmem [shape: f32[2,32,32], index: 2, kind: input, shape index: {}]   ;;  %s4005_s3 = inlined_call_operand.vmem [shape: f32[2,32,32], index: 3, kind: input, shape index: {}]   ;;  %s4006_s4 = inlined_call_operand.vmem [shape: f32[2,32,32], index: 4, kind: input, shape index: {}]   ;;  %s4007_s5 = inlined_call_operand.vmem [shape: f32[2,1,32], index: 5, kind: input, shape index: {}]   ;;  %s4008_s6 = inlined_call_operand.vmem [shape: f32[2,1,32], index: 6, kind: input, shape index: {}]   ;;  %s4009_s7 = inlined_call_operand.vmem [shape: f32[2,1,32], index: 7, kind: input, shape index: {}]   ;;  %s4010_s8 = inlined_call_operand.hbm [shape: f32[2,32,32], index: 8, kind: input, shape index: {}]   ;;  %s4011_s9 = inlined_call_operand.vmem [shape: f32[2,1,32], index: 9, kind: input, shape index: {}]   ;;  %s4012_s10 = inlined_call_operand.vmem [shape: f32[2,64,32], index: 10, kind: input, shape index: {}]   ;;  %s4013_s11 = inlined_call_operand.vmem [shape: f32[2,1,64], index: 11, kind: input, shape index: {}]   ;;  %s4014_s12 = inlined_call_operand.hbm [shape: f32[2,32,64], index: 12, kind: input, shape index: {}]   ;;  %s4015_s13 = inlined_call_operand.vmem [shape: f32[2,1,32], index: 13, kind: input, shape index: {}]   ;;  %s4016_s14 = inlined_call_operand.vmem [shape: f32[2,1,32], index: 14, kind: input, shape index: {}]   ;;  %s4017_s15 = inlined_call_operand.vmem [shape: f32[2,1,32], index: 15, kind: input, shape index: {}]   ;;  %s4018_s16 = inlined_call_operand.vmem [shape: f32[2,1,32], index: 16, kind: input, shape index: {}]   ;;  %s4019_s17 = inlined_call_operand.vmem [shape: f32[2,1,32], index: 17, kind: input, shape index: {}]   ;;  %s4020_s18 = inlined_call_operand.vmem [shape: f32[1,32], index: 18, kind: input, shape index: {}]   ;;  %s4021_s19 = inlined_call_operand.vmem [shape: f32[1,32], index: 19, kind: input, shape index: {}]   ;;  %s4022_s20 = inlined_call_operand.hbm [shape: f32[2,8,32], index: 20, kind: output, shape index: {}]  }
   0x1   :  { %4036 = sst [smem:[#allocation23_spill]] %s4002_s0 }
   0x2   :  { %4037 = sst [smem:[#allocation24_spill]] %s4003_s1 }
   0x3   :  { %4038 = sst [smem:[#allocation25_spill]] %s4004_s2 }
   0x4   :  { %4039 = sst [smem:[#allocation26_spill]] %s4005_s3 }
   0x5   :  { %4040 = sst [smem:[#allocation27_spill]] %s4006_s4 }
   0x6   :  { %4041 = sst [smem:[#allocation28_spill]] %s4010_s8 }
   0x7   :  { %4042 = sst [smem:[#allocation29_spill]] %s4011_s9 }
   0x8   :  { %4043 = sst [smem:[#allocation30_spill]] %s4012_s10 }
   0x9   :  { %4044 = sst [smem:[#allocation31_spill]] %s4013_s11 }
   0xa   :  { %4045 = sst [smem:[#allocation32_spill]] %s4014_s12 }
   0xb   :  { %4046 = sst [smem:[#allocation33_spill]] %s4015_s13 }
   0xc   :  { %4047 = sst [smem:[#allocation34_spill]] %s4016_s14 }
   0xd   :  { %4048 = sst [smem:[#allocation35_spill]] %s4017_s15 }
   0xe   :  { %4049 = sst [smem:[#allocation36_spill]] %s4018_s16 }
   0xf   :  { %4050 = sst [smem:[#allocation37_spill]] %s4019_s17 }
  0x10   :  { %4051 = sst [smem:[#allocation38_spill]] %s4020_s18 }
  0x11   :  { %4052 = sst [smem:[#allocation39_spill]] %s4021_s19 }
  0x12   :  { %4053 = sst [smem:[#allocation40_spill]] %s4022_s20 }
  0x13   :  { %25 = vsyncpa [#allocation4], 0 }
  0x14   :  { %26 = vsyncpa [#allocation7], 0 }
  0x15   :  { %27 = vsyncpa [#allocation5], 0  ;;  %s3420_s1 = smov 0   ;;  %s3422_s22 = smov 0  }
  0x16   :  { %s3424_s23 = smov 0   ;;  %s3426_s24 = smov 0  }
  0x17   :  { %s3428_s2 = smov 0   ;;  %s3430_s25 = smov 0  }
  0x18 LB: > { %4054 = sst [smem:[#allocation15_spill]] %s3280_s22  ;;  %s3449_s3 = sadd.s32 4294967295, %s3296_s25   ;;  %s3296_s25 = sphi %s3430_s25, %s33_s25   ;;  %s3292_s2 = sphi %s3428_s2, %s4110_s2   ;;  %s3288_s24 = sphi %s3426_s24, %s4109_s24   ;;  %s3284_s23 = sphi %s3424_s23, %s4108_s23   ;;  %s3280_s22 = sphi %s3422_s22, %s4107_s22   ;;  %s3276_s1 = sphi %s3420_s1, %s4106_s1  }
  0x19   : > { %4055 = sst [smem:[#allocation16_spill]] %s3284_s23  ;;  %p262_p0 = scmp.ne.s32.totalorder %s3284_s23, %s3280_s22 }
  0x1a   : > { %4056 = sst [smem:[#allocation17_spill]] %s3292_s2  ;;  %p263_p1 = scmp.eq.s32.totalorder %s3296_s25, 0 }
  0x1b   : > { %4057 = sst [smem:[#allocation18_spill]] %s3296_s25  ;;  %p268_p2 = scmp.ne.s32.totalorder %s3280_s22, %s3276_s1 }
  0x1c   : > { %4058 = sst [smem:[#allocation19_spill]] %s3449_s3  ;;  %p4023_p3 = scmp.eq.s32.totalorder %s3449_s3, 0 }
  0x1d   : > { %p264_p4 = por %p263_p1, %p262_p0  ;;  %p2674_p5 = scmp.ge.s32.totalorder %s3296_s25, 1 }
  0x1e   : > { %p3460_p6 = por %p4023_p3, %p268_p2  ;;  %p581_p7 = scmp.lt.s32.totalorder %s3296_s25, 3 }
  0x1f   : > { %s3298_s4 = smov [#allocation3]   ;;  %p2975_p10 = scmp.lt.s32.totalorder %s3296_s25, 2 }
  0x20   : > { %p3465_p8 = pnand %p2674_p5, %p581_p7  ;;  %s596_s29 = sshll.u32 %s3298_s4, 4  ;;  %s597_s29 = int_to_ptr.vmem [resolvable:$true] %s596_s29 }
  0x21   : > { %p3478_p12 = pnand %p2975_p10, %p264_p4  ;;  %s42_s21 = sadd.s32 1, %s3292_s2 }
  0x22   : > { %p2959_p9 = pneg %p3465_p8  ;;  %s3113_s1 = scalar_lea.vmem %s597_s29, 256 }
  0x23   : > { %p3114_p0 = scmp.ne.s32.totalorder %s597_s29, %s3113_s1  ;;  %p3121_p5 = scmp.lt.s32.totalorder %s597_s29, %s597_s29 }
  0x24   : > { %p3474_p11 = pnand %p2959_p9, %p4023_p3  ;;  %p3122_p7 = scmp.lt.s32.totalorder %s3113_s1, %s3113_s1 }
  0x26   : > { %p3104_p13 = pneg %p3474_p11  ;;  %p3123_p9 = por %p3122_p7, %p3121_p5 }
  0x28   : > { %p3116_p1 = pnand %p3114_p0, %p3104_p13 }
  0x2a   : > { %p3117_p2 = pneg %p3116_p1 }
  0x2c   : > { %p3124_p3 = pnand %p3123_p9, %p3117_p2 }
  0x2e   : > { %3127 = shalt.err (!%p3124_p3)
}
  0x2f   : > { %s4024_s4 = smov 128   ;;  %s4026_s26 = smov 8  }
  0x30   : > { %s4063_s18 = sld [smem:[#allocation23_spill]]  ;;  %p43_p4 = scmp.ge.s32.totalorder %s42_s21, 2 }
  0x31   : > { %s669_s1 = sand.u32 1, %s3296_s25   ;;  %s671_s17 = sand.u32 1, %s3284_s23  }
  0x32   : > { %s4112_s21 = smov (%p43_p4, %s42_s21), 0  ;;  %s3500_s16 = sshll.u32 %s671_s17, 5 }
  0x33   : > { %4064 = sst [smem:[#allocation20_spill]] %s4112_s21  ;;  %s252_s15 = ssub.s32 %s3292_s2, %s4112_s21 }
  0x34   : > { %p253_p3 = scmp.eq.s32.totalorder %s252_s15, 0  ;;  %s2737_s14 = sshll.u32 %s3292_s2, 9 }
  0x35   : > { %s4065_s8 = sld [smem:[#allocation28_spill]]  ;;  %s673_s19 = scalar_lea.vmem [#allocation8], %s3500_s16 }
  0x36   : > { %2962 = dma.hbm_to_vmem [thread:$0]  (!%p3474_p11), %s4063_s18, 256, %s597_s29, [#allocation4], %s4024_s4, %s4024_s4, %s4026_s26  }
  0x37   : > { %s680_s20 = sshll.u32 %s673_s19, 4  ;;  %s4066_s18 = sadd.s32 1, %s3284_s23  ;;  %s681_s20 = int_to_ptr.vmem [resolvable:$true] %s680_s20 }
  0x38   : > { %s3512_s29 = scalar_select %p253_p3, %s3284_s23, %s4066_s18  }
  0x39   : > { %s3514_s4 = scalar_lea.sflag [#allocation4], %s669_s1  ;;  %p3130_p10 = pneg %p3478_p12 }
  0x3a   : > { %4067 = sst [smem:[#allocation21_spill]] %s3512_s29  ;;  %s3141_s17 = scalar_lea.vmem %s681_s20, 512 }
  0x3b   : > { %s679_s11 = scalar_lea.hbm %s4065_s8, %s2737_s14  ;;  %p3142_p0 = scmp.ne.s32.totalorder %s681_s20, %s3141_s17 }
  0x3c   : > { %s3301_s15 = smov [#allocation8]  }
  0x3d   : > { %p3144_p1 = pnand %p3142_p0, %p3130_p10  ;;  %s3146_s26 = sshll.u32 %s3301_s15, 4  ;;  %s3147_s26 = int_to_ptr.vmem [resolvable:$false] %s3146_s26 }
  0x3e   : > { %s3148_s10 = scalar_lea.vmem %s3147_s26, 1024  ;;  %p3149_p5 = scmp.lt.s32.totalorder %s681_s20, %s3147_s26 }
  0x3f   : > { %p3145_p2 = pneg %p3144_p1  ;;  %p3150_p7 = scmp.lt.s32.totalorder %s3148_s10, %s3141_s17 }
  0x41   : > { %p3151_p9 = por %p3150_p7, %p3149_p5 }
  0x43   : > { %p3152_p4 = pnand %p3151_p9, %p3145_p2 }
  0x45   : > { %3155 = shalt.err (!%p3152_p4)
}
  0x46   : > { %s4068_s13 = smov 8   ;;  %s4069_s1 = smov 128  }
  0x47   : > { %2969 = dma.hbm_to_vmem [thread:$0]  (!%p3478_p12), %s679_s11, 512, %s681_s20, %s3514_s4, %s4069_s1, %s4069_s1, %s4068_s13  }
  0x48   : > { %s3302_s19 = smov [#allocation6]   ;;  %s4070_s12 = sld [smem:[#allocation32_spill]] }
  0x49   : > { %s610_s18 = sshll.u32 %s3302_s19, 4  ;;  %s611_s18 = int_to_ptr.vmem [resolvable:$true] %s610_s18 }
  0x4a   : > { %s3167_s26 = scalar_lea.vmem %s611_s18, 128  ;;  %p3175_p2 = scmp.lt.s32.totalorder %s611_s18, %s611_s18 }
  0x4b   : > { %p3168_p3 = scmp.ne.s32.totalorder %s611_s18, %s3167_s26  ;;  %p3176_p5 = scmp.lt.s32.totalorder %s3167_s26, %s3167_s26 }
  0x4d   : > { %p3170_p0 = pnand %p3168_p3, %p3104_p13  ;;  %p3177_p7 = por %p3176_p5, %p3175_p2 }
  0x4e   : > { %s3530_s21 = scalar_lea.hbm %s4070_s12, %s2737_s14 }
  0x4f   : > { %p3171_p1 = pneg %p3170_p0 }
  0x51   : > { %p3178_p9 = pnand %p3177_p7, %p3171_p1 }
  0x53   : > { %3181 = shalt.err (!%p3178_p9)
}
  0x54   : > { %s4071_s17 = sld [smem:[#allocation24_spill]]  ;;  %s714_s8 = scalar_lea.vmem [#allocation9], %s3500_s16 }
  0x55   : > { %s721_s14 = sshll.u32 %s714_s8, 4  ;;  %s3303_s19 = smov [#allocation9]   ;;  %s722_s14 = int_to_ptr.vmem [resolvable:$true] %s721_s14 }
  0x56   : > { %s3195_s10 = scalar_lea.vmem %s722_s14, 512  ;;  %s3200_s15 = sshll.u32 %s3303_s19, 4  ;;  %s3201_s15 = int_to_ptr.vmem [resolvable:$false] %s3200_s15 }
  0x57   : > { %p3196_p4 = scmp.ne.s32.totalorder %s722_s14, %s3195_s10  ;;  %s3202_s26 = scalar_lea.vmem %s3201_s15, 1024 }
  0x58   : > { %p3203_p0 = scmp.lt.s32.totalorder %s722_s14, %s3201_s15  ;;  %p3204_p1 = scmp.lt.s32.totalorder %s3202_s26, %s3195_s10 }
  0x59   : > { %p3198_p13 = pnand %p3196_p4, %p3130_p10 }
  0x5a   : > { %2965 = dma.hbm_to_vmem [thread:$0]  (!%p3474_p11), %s4071_s17, 128, %s611_s18, [#allocation7]  }
  0x5b   : > { %p3199_p3 = pneg %p3198_p13  ;;  %p3205_p2 = por %p3204_p1, %p3203_p0 }
  0x5d   : > { %p3206_p5 = pnand %p3205_p2, %p3199_p3 }
  0x5f   : > { %3209 = shalt.err (!%p3206_p5)
}
  0x60   : > { %2972 = dma.hbm_to_vmem [thread:$0]  (!%p3478_p12), %s3530_s21, 512, %s722_s14, %s3514_s4, %s4069_s1, %s4069_s1, %s4068_s13  }
  0x61   : > { %763 = sbr.rel (%p3465_p8) target bundleno = 4306 (0x10d2), region = 100 }
  0x66   : > { %p4072_p11 = scmp.eq.s32.totalorder %s3449_s3, 0 }
  0x68   : > { %3259 = dma.done.wait (%p4072_p11), [#allocation4], 256   ;;  %p4073_p10 = pmov %p4072_p11 }
  0x6a   : > { %3261 = vsyncadd (%p4073_p10), [#allocation4], 4294967040  ;;  %p4074_p7 = pmov %p4073_p10 }
  0x6c   : > { %3263 = dma.done.wait (%p4074_p7), [#allocation7], 128   ;;  %p4075_p9 = pmov %p4074_p7 }
  0x6d   : > { %s773_s16 = sand.u32 1, %s3449_s3   ;;  %s775_s30 = sand.u32 1, %s3280_s22  }
  0x6e   : > { %3265 = vsyncadd (%p4075_p9), [#allocation7], 4294967168  ;;  %s2687_s0 = sshll.u32 %s775_s30, 5  ;;  %s774_s28 = scalar_lea.sflag [#allocation4], %s773_s16 }
  0x6f   : > { %s3563_s21 = scalar_lea.vmem [#allocation8], %s2687_s0 }
  0x70   : > { %4076 = sst [smem:[#allocation22_spill]] %s3563_s21 }
  0x71   : > { %3267 = dma.done.wait (%p3460_p6), %s774_s28, 1024  }
  0x72   : > { %3269 = vsyncadd (%p3460_p6), %s774_s28, 4294966272  ;;  %p894_p8 = scmp.lt.s32.totalorder %s3288_s24, 1  ;;  %s4077_s17 = sld [smem:[#allocation25_spill]] }
  0x73   : > { %s4078_s19 = sld [smem:[#allocation26_spill]]  ;;  %p2697_p6 = scmp.ne.s32.totalorder %s3288_s24, 0 }
  0x74   : > { %s3571_s4 = scalar_select %p894_p8, %s3288_s24, 1 }
  0x75   : > { %s4079_s30 = sld [smem:[#allocation27_spill]] }
  0x76   : > { %s2739_s13 = sshll.u32 %s3571_s4, 5  ;;  %s2742_s14 = sshll.u32 %s3571_s4, 6 }
  0x77   : > { %s4082_s16 = sld [smem:[#allocation30_spill]] }
  0x78   : > { %s3581_s8 = scalar_lea.vmem %s4077_s17, %s2739_s13  ;;  %s4083_s27 = sld [smem:[#allocation33_spill]] }
  0x79   : > { %s3586_s15 = scalar_lea.vmem %s4078_s19, %s2739_s13  ;;  %s4084_s11 = sld [smem:[#allocation34_spill]] }
  0x7a   : > { %s4085_s29 = sld [smem:[#allocation35_spill]] }
  0x7b   : > { %s3591_s28 = scalar_lea.vmem %s4079_s30, %s2739_s13  ;;  %s4086_s23 = sld [smem:[#allocation36_spill]] }
  0x7d   : > { %s3613_s30 = scalar_lea.vmem %s4082_s16, %s2742_s14  ;;  %s4087_s14 = sld [smem:[#allocation37_spill]] }
  0x7e   : > { %s931_s25 = scalar_lea.vmem %s4083_s27, %s3571_s4  ;;  %s3635_s16 = scalar_lea.vmem [#allocation9], %s2687_s0 }
  0x7f   : > { %s934_s3 = scalar_lea.vmem %s4084_s11, %s3571_s4  ;;  %949 = sbr.rel (%p2697_p6) target bundleno = 138 (0x8a), region = 120 }
  0x80   : > { %s937_s9 = scalar_lea.vmem %s4085_s29, %s3571_s4 }
  0x81   : > { %s940_s19 = scalar_lea.vmem %s4086_s23, %s3571_s4 }
  0x83   : > { %s943_s13 = scalar_lea.vmem %s4087_s14, %s3571_s4 }
  0x84   : > { %v950_v0 = vld [vmem:[#allocation3] sm:$0xff]  ;;  %v952_v1 = vld [vmem:[#allocation6] sm:$0xff]  ;;  %v951_v2 = vld [vmem:[#allocation3 + $0x8] sm:$0xff]  ;;  %vm957_vm0 = vcmask 261120  }
  0x85   : > { %v953_v3 = vadd.f32 %v952_v1, %v950_v0  ;;  %v954_v4 = vadd.f32 %v952_v1, %v951_v2 }
  0x87   : > { %v955_v5 = vmul.f32 5.656854, %v953_v3  ;;  %v956_v6 = vmul.f32 5.656854, %v954_v4 }
  0x89   : > { %958 = vst.msk [vmem:[#allocation2] sm:$0xff] %vm957_vm0, %v955_v5  ;;  %959 = vst.msk [vmem:[#allocation2 + $0x8] sm:$0xff] %vm957_vm0, %v956_v6 }
  0x8a PF: > { %vm976_vm1 = vcmask 261120   ;;  %v1031_v7 = vld [vmem:[%s3586_s15 + $0x10] sm:$0xff]  ;;  %v1032_v8 = vld [vmem:[%s3586_s15 + $0x18] sm:$0xff]  ;;  %v3304_v10 = vmov 0.0   ;;  %v1029_v14 = vld [vmem:[%s3586_s15] sm:$0xff]  ;;  %vm3305_vm2 = vmmov 0   ;;  %s4088_s0 = scalar_lea.vmem %s4008_s6, %s3571_s4  ;;  %v1149_v57 = vlaneseq  ;;  %s4090_s12 = scalar_lea.vmem %s4009_s7, %s3571_s4 }
  0x8b   : > { %v964_v9 = vld [vmem:[%s3581_s8 + $0x10] sm:$0xff]  ;;  %2803 = vmatprep.subr.bf16.mxu1 %v3304_v10  ;;  %2795 = vmatprep.subr.bf16.mxu0 %v3304_v10  ;;  %v1034_v11 = vpack.c.bf16 %v1032_v8, %v1031_v7  ;;  %v965_v12 = vld [vmem:[%s3581_s8 + $0x18] sm:$0xff]  ;;  %v1030_v15 = vld [vmem:[%s3586_s15 + $0x8] sm:$0xff]  ;;  %s4089_s15 = scalar_lea.vmem %s4007_s5, %s3571_s4  ;;  %vm1159_vm3 = vcmask 64512   ;;  %s3306_s27 = smov 120   ;;  %vm1281_vm5 = vcmask 1043456  }
  0x8c   : > { %v968_v13 = vpack.c.bf16 %v965_v12, %v964_v9  ;;  %2807 = vmatprep.mubr.msk.bf16.mxu1 %vm3305_vm2, %v3304_v10  ;;  %2799 = vmatprep.mubr.msk.bf16.mxu0 %vm3305_vm2, %v3304_v10  ;;  %v962_v17 = vld [vmem:[%s3581_s8] sm:$0xff]  ;;  %v963_v18 = vld [vmem:[%s3581_s8 + $0x8] sm:$0xff]  ;;  %v1033_v20 = vpack.c.bf16 %v1030_v15, %v1029_v14  ;;  %v1091_v49 = vld [vmem:[%s3591_s28 + $0x10] sm:$0xff]  ;;  %v1150_v58 = vshrl.u32 %v1149_v57, 7  ;;  %v1152_v59 = vand.u32 127, %v1149_v57  ;;  %s3308_s2 = smov 112  }
  0x8d   : > { %v1046_v16 = vsel %vm976_vm1, %v1034_v11, 0  ;;  %v967_v21 = vpack.c.bf16 %v963_v18, %v962_v17  ;;  %v2700_v27 = vld [vmem:[%s4088_s0] ss:$0 sm:$0xff]  ;;  %v1092_v50 = vld [vmem:[%s3591_s28 + $0x18] sm:$0xff]  ;;  %v1090_v53 = vld [vmem:[%s3591_s28 + $0x8] sm:$0xff]  ;;  %s3309_s18 = smov 104  }
  0x8e   : > { %2804 = vmatpush3.bf16.xpose.msra.mxu1 %v1046_v16  ;;  %v984_v19 = vsel %vm976_vm1, %v968_v13, 0  ;;  %v1043_v22 = vsel %vm976_vm1, %v1033_v20, 0  ;;  %v2698_v28 = vld [vmem:[%s4089_s15] ss:$0 sm:$0xff]  ;;  %v1094_v51 = vpack.c.bf16 %v1092_v50, %v1091_v49  ;;  %vm1153_vm4 = vcmp.ge.s32.totalorder %v1150_v58, %v1152_v59  ;;  %s3310_s1 = smov 8   ;;  %s3311_s20 = smov 16  }
  0x8f   : > { %2796 = vmatpush3.bf16.xpose.msra.mxu0 %v984_v19  ;;  %2805 = vmatprep.subr.bf16.mxu1 %v3304_v10  ;;  %v981_v23 = vsel %vm976_vm1, %v967_v21, 0  ;;  %v1089_v52 = vld [vmem:[%s3591_s28] sm:$0xff]  ;;  %v3307_v60 = vmov -1e+30   ;;  %s4091_s17 = sld [smem:[#allocation22_spill]]  ;;  %s3312_s10 = smov 24  }
  0x90   : > { %2797 = vmatprep.subr.bf16.mxu0 %v3304_v10  ;;  %v3658_v24 = vld [vmem:[#allocation2] sm:$0xff]  ;;  %v3660_v25 = vld [vmem:[#allocation2 + $0x8] sm:$0xff]  ;;  %v1106_v54 = vsel %vm976_vm1, %v1094_v51, 0  ;;  %v1093_v55 = vpack.c.bf16 %v1090_v53, %v1089_v52  ;;  %v3717_v61 = vsel %vm1153_vm4, 0.0, %v3307_v60  ;;  %vm2063_vm6 = vcmask 130048   ;;  %s4092_s14 = sld [smem:[#allocation29_spill]] }
  0x91   : > { %v966_v26 = vpack.c.bf16 %v3660_v25, %v3658_v24  ;;  %vm2066_vm7 = vcmask 195584   ;;  %vm2272_vm8 = vcmask 523264   ;;  %s4096_s28 = sld [smem:[#allocation31_spill]]  ;;  %p2730_p12 = scmp.ne.s32.totalorder %s3288_s24, 1 }
  0x92   : > { %v1103_v56 = vsel %vm976_vm1, %v1093_v55, 0  ;;  %s4102_s26 = sld [smem:[#allocation39_spill]] (!%p2730_p12) }
  0x96   : > { %2806 = vmatpush3.bf16.xpose.msra.mxu1 %v1043_v22  ;;  %v2702_v22 = vld [vmem:[%s4090_s12] ss:$0 sm:$0xff]  ;;  %s4093_s22 = scalar_lea.vmem %s4092_s14, %s3571_s4 }
  0x97   : > { %2798 = vmatpush3.bf16.xpose.msra.mxu0 %v981_v23  ;;  %2819 = vmatprep.subr.bf16.mxu1 %v3304_v10  ;;  %s4097_s11 = scalar_lea.vmem %s4096_s28, %s3571_s4 }
  0x98   : > { %2811 = vmatprep.subr.bf16.mxu0 %v3304_v10 }
  0x9d   : > { %2808 = vmatmul.mubr.msk.bf16.vlgmr.msra.gmra.mxu1 %vm976_vm1, %v966_v26 }
  0x9e   : > { %2800 = vmatmul.mubr.msk.bf16.vlgmr.msra.gmra.mxu0 %vm976_vm1, %v966_v26  ;;  %2821 = vmatprep.mubr.msk.bf16.mxu1 %vm3305_vm2, %v3304_v10 }
  0x9f   : > { %2815 = vmatprep.mubr.msk.bf16.mxu0 %vm3305_vm2, %v3304_v10  ;;  %2812 = vmatpush3.bf16.xpose.msra.mxu0 %v1106_v54 }
  0xa0   : > { %2813 = vmatprep.subr.bf16.mxu0 %v3304_v10 }
  0xa7   : > { %2814 = vmatpush3.bf16.xpose.msra.mxu0 %v1103_v56 }
  0xa8   : > { %2831 = vmatprep.subr.bf16.mxu0 %v3304_v10 }
  0xae   : > { %2816 = vmatmul.mubr.msk.bf16.vlgmr.msra.gmra.mxu0 %vm976_vm1, %v966_v26 }
  0xaf   : > { %2833 = vmatprep.mubr.msk.bf16.mxu0 %vm3305_vm2, %v3304_v10 }
 0x15d   : > { %v1082_v29 = vpop.f32.mrf.mxu1 }
 0x15e   : > { %v1083_v30 = vadd.f32 %v2700_v27, %v1082_v29  ;;  %v1020_v31 = vpop.f32.mrf.mxu0 }
 0x15f   : > { %v1021_v32 = vadd.f32 %v2698_v28, %v1020_v31  ;;  %v2809_v33 = vpop.f32.mrf.mxu1 }
 0x160   : > { %v3682_v34 = vpack.c.bf16 %v1083_v30, %v1083_v30  ;;  %v2801_v35 = vpop.f32.mrf.mxu0 }
 0x161   : > { %v1085_v36 = vpop.f32.mrf.mxu1  ;;  %v1027_v37 = vmul.f32 0.35355338, %v1021_v32 }
 0x162   : > { %v1086_v38 = vadd.f32 %v2700_v27, %v1085_v36  ;;  %v1023_v39 = vpop.f32.mrf.mxu0  ;;  %v1164_v40 = vsel %vm1159_vm3, %v3682_v34, 0 }
 0x163   : > { %v2810_v41 = vpop.f32.mrf.mxu1  ;;  %2820 = vmatpush3.bf16.xpose.msra.mxu1 %v1164_v40  ;;  %v3689_v44 = vpack.c.bf16 %v1027_v37, %v1027_v37  ;;  %v1024_v45 = vadd.f32 %v2698_v28, %v1023_v39 }
 0x164   : > { %v3686_v42 = vpack.c.bf16 %v1086_v38, %v1086_v38  ;;  %v2802_v43 = vpop.f32.mrf.mxu0  ;;  %2825 = vmatprep.subr.bf16.mxu1 %v3304_v10 }
 0x165   : > { %v1028_v47 = vmul.f32 0.35355338, %v1024_v45 }
 0x166   : > { %1427 = vrot.lane.b32.xlu1 %v3686_v42, %s3306_s27  ;;  %v1210_v46 = vsel %vm1159_vm3, %v3686_v42, 0 }
 0x167   : > { %v3700_v48 = vpack.c.bf16 %v1028_v47, %v1028_v47 }
 0x16a   : > { %2822 = vmatmul.mubr.msk.bf16.vlgmr.msra.gmra.mxu1 %vm1159_vm3, %v3689_v44 }
 0x16b   : > { %2826 = vmatpush3.bf16.xpose.msra.mxu1 %v1210_v46  ;;  %2827 = vmatprep.mubr.msk.bf16.mxu1 %vm3305_vm2, %v3304_v10 }
 0x16c   : > { %2837 = vmatprep.subr.bf16.mxu1 %v3304_v10 }
 0x16e   : > { %v1142_v21 = vpop.f32.mrf.mxu0 }
 0x16f   : > { %v1143_v26 = vadd.f32 %v2702_v22, %v1142_v21 }
 0x170   : > { %v2817_v23 = vpop.f32.mrf.mxu0 }
 0x171   : > { %v3732_v27 = vpack.c.bf16 %v1143_v26, %v1143_v26 }
 0x172   : > { %2828 = vmatmul.mubr.msk.bf16.vlgmr.msra.gmra.mxu1 %vm1159_vm3, %v3700_v48  ;;  %v1145_v28 = vpop.f32.mrf.mxu0 }
 0x173   : > { %2839 = vmatprep.mubr.msk.bf16.mxu1 %vm3305_vm2, %v3304_v10  ;;  %v1146_v29 = vadd.f32 %v2702_v22, %v1145_v28  ;;  %v1283_v32 = vsel %vm1281_vm5, %v3732_v27, 0 }
 0x174   : > { %v2818_v30 = vpop.f32.mrf.mxu0  ;;  %2832 = vmatpush3.bf16.msra.mxu0 %v1283_v32 }
 0x175   : > { %v3734_v31 = vpack.c.bf16 %v1146_v29, %v1146_v29  ;;  %2843 = vmatprep.subr.bf16.mxu0 %v3304_v10 }
 0x177   : > { %v1329_v33 = vsel %vm1281_vm5, %v3734_v31, 0 }
 0x178   : > { %2838 = vmatpush3.bf16.msra.mxu1 %v1329_v33 }
 0x179   : > { %2849 = vmatprep.subr.bf16.mxu1 %v3304_v10 }
 0x1d8   : > { %v1428_v35 = vpop.permute.xlu1 %1427 }
 0x1d9   : > { %v1433_v50 = vsel %vm1159_vm3, %v1428_v35, 0 }
 0x22a   : > { %v1200_v62 = vpop.f32.mrf.mxu1 }
 0x22b   : > { %v1201_v63 = vadd.f32 %v1200_v62, %v3717_v61 }
 0x22c   : > { %v2823_v0 = vpop.f32.mrf.mxu1 }
 0x22d   : > { %v1252_v1 = vsel %vm1159_vm3, %v1201_v63, -inf }
 0x22e   : > { %1253 = vmax.xlane.f32.xlu0 %v1252_v1  ;;  %v1203_v2 = vpop.f32.mrf.mxu1 }
 0x230   : > { %v2824_v3 = vpop.f32.mrf.mxu1 }
 0x232   : > { %v1246_v4 = vpop.f32.mrf.mxu1 }
 0x233   : > { %v1247_v5 = vadd.f32 %v1246_v4, %v3717_v61 }
 0x234   : > { %v2829_v6 = vpop.f32.mrf.mxu1 }
 0x235   : > { %v1255_v7 = vsel %vm1159_vm3, %v1247_v5, -inf }
 0x236   : > { %1256 = vmax.xlane.f32.xlu0 %v1255_v7  ;;  %v1249_v8 = vpop.f32.mrf.mxu1 }
 0x238   : > { %v2830_v9 = vpop.f32.mrf.mxu1 }
 0x24c   : > { %1375 = vrot.lane.b32.xlu0 %v3682_v34, %s3306_s27 }
 0x2b7   : > { %v1254_v11 = vpop.xlane.xlu0 %1253 }
 0x2b8   : > { %v1258_v12 = vsub.f32 %v1201_v63, %v1254_v11 }
 0x2ba   : > { %v1260_v13 = vmul.f32 1.442695, %v1258_v12 }
 0x2bc   : > { %3058 = vpow2.f32 %v1260_v13 }
 0x2bf   : > { %v1257_v14 = vpop.xlane.xlu0 %1256 }
 0x2c0   : > { %v1259_v15 = vsub.f32 %v1247_v5, %v1257_v14 }
 0x2c2   : > { %v1262_v16 = vmul.f32 1.442695, %v1259_v15 }
 0x2c3   : > { %v1376_v40 = vpop.permute.xlu0 %1375 }
 0x2c4   : > { %3060 = vpow2.f32 %v1262_v16  ;;  %v1381_v43 = vsel %vm1159_vm3, %v1376_v40, 0 }
 0x2c9   : > { %v3059_v17 = vpop.eup %3058 }
 0x2ca   : > { %v1264_v18 = vsel %vm1159_vm3, %v3059_v17, 0.0 }
 0x2cb   : > { %1265 = vadd.xlane.f32.xlu1 %v1264_v18 }
 0x2d1   : > { %v3061_v19 = vpop.eup %3060 }
 0x2d2   : > { %v1267_v20 = vsel %vm1159_vm3, %v3061_v19, 0.0 }
 0x2d3   : > { %1268 = vadd.xlane.f32.xlu1 %v1267_v20 }
 0x2e4   : > { %1372 = vrot.lane.b32.xlu1 %v3689_v44, %s3306_s27 }
 0x2e8   : > { %1424 = vrot.lane.b32.xlu1 %v3700_v48, %s3306_s27 }
 0x354   : > { %v1266_v36 = vpop.xlane.xlu1 %1265 }
 0x355   : > { %3062 = vrcp.f32 %v1266_v36 }
 0x35c   : > { %v1269_v37 = vpop.xlane.xlu1 %1268 }
 0x35d   : > { %3064 = vrcp.f32 %v1269_v37 }
 0x360   : > { %v1373_v49 = vpop.permute.xlu1 %1372 }
 0x362   : > { %v3063_v38 = vpop.eup %3062 }
 0x363   : > { %v1272_v39 = vmul.f32 %v3063_v38, %v3059_v17 }
 0x364   : > { %v1425_v51 = vpop.permute.xlu1 %1424 }
 0x365   : > { %v1274_v41 = vpack.c.bf16 %v1272_v39, %v1272_v39 }
 0x367   : > { %2834 = vmatmul.mubr.msk.bf16.vlgmr.msra.gmra.mxu0 %vm1159_vm3, %v1274_v41 }
 0x368   : > { %2844 = vmatpush3.bf16.xpose.msra.mxu0 %v1381_v43  ;;  %2845 = vmatprep.mubr.msk.bf16.mxu0 %vm3305_vm2, %v3304_v10 }
 0x369   : > { %2855 = vmatprep.subr.bf16.mxu0 %v3304_v10 }
 0x36a   : > { %v3065_v45 = vpop.eup %3064 }
 0x36b   : > { %v1273_v46 = vmul.f32 %v3065_v45, %v3061_v19 }
 0x36d   : > { %v1275_v47 = vpack.c.bf16 %v1273_v46, %v1273_v46 }
 0x36f   : > { %2840 = vmatmul.mubr.msk.bf16.vlgmr.msra.gmra.mxu1 %vm1159_vm3, %v1275_v47  ;;  %2846 = vmatmul.mubr.msk.bf16.vlgmr.msra.gmra.mxu0 %vm1159_vm3, %v1373_v49 }
 0x370   : > { %2850 = vmatpush3.bf16.xpose.msra.mxu1 %v1433_v50  ;;  %2851 = vmatprep.mubr.msk.bf16.mxu1 %vm3305_vm2, %v3304_v10 }
 0x371   : > { %2861 = vmatprep.subr.bf16.mxu1 %v3304_v10  ;;  %2857 = vmatprep.mubr.msk.bf16.mxu0 %vm3305_vm2, %v3304_v10 }
 0x377   : > { %2852 = vmatmul.mubr.msk.bf16.vlgmr.msra.gmra.mxu1 %vm1159_vm3, %v1425_v51 }
 0x378   : > { %2863 = vmatprep.mubr.msk.bf16.mxu1 %vm3305_vm2, %v3304_v10 }
 0x427   : > { %v3762_v52 = vpop.f32.mrf.mxu0 }
 0x429   : > { %v2835_v53 = vpop.f32.mrf.mxu0 }
 0x42b   : > { %v1322_v54 = vpop.f32.mrf.mxu0 }
 0x42d   : > { %v2836_v55 = vpop.f32.mrf.mxu0 }
 0x42f   : > { %v3764_v56 = vpop.f32.mrf.mxu1  ;;  %v1417_v57 = vpop.f32.mrf.mxu0 }
 0x430   : > { %v1418_v58 = vadd.f32 %v1417_v57, %v3717_v61 }
 0x431   : > { %v2841_v59 = vpop.f32.mrf.mxu1  ;;  %v2847_v60 = vpop.f32.mrf.mxu0 }
 0x432   : > { %v1475_v62 = vsel %vm1159_vm3, %v1418_v58, -inf }
 0x433   : > { %v1368_v63 = vpop.f32.mrf.mxu1  ;;  %1476 = vmax.xlane.f32.xlu0 %v1475_v62  ;;  %v1420_v0 = vpop.f32.mrf.mxu0 }
 0x435   : > { %v2842_v1 = vpop.f32.mrf.mxu1  ;;  %v2848_v2 = vpop.f32.mrf.mxu0 }
 0x437   : > { %v1469_v3 = vpop.f32.mrf.mxu1 }
 0x438   : > { %v1470_v4 = vadd.f32 %v1469_v3, %v3717_v61 }
 0x439   : > { %v2853_v5 = vpop.f32.mrf.mxu1 }
 0x43a   : > { %v1478_v6 = vsel %vm1159_vm3, %v1470_v4, -inf }
 0x43b   : > { %1479 = vmax.xlane.f32.xlu1 %v1478_v6  ;;  %v1472_v7 = vpop.f32.mrf.mxu1 }
 0x43d   : > { %v2854_v8 = vpop.f32.mrf.mxu1 }
 0x44c   : > { %1549 = vrot.lane.b32.xlu1 %v3734_v31, %s3306_s27 }
 0x450   : > { %1599 = vrot.lane.b32.xlu1 %v3682_v34, %s3308_s2 }
 0x454   : > { %1649 = vrot.lane.b32.xlu1 %v3686_v42, %s3308_s2 }
 0x458   : > { %1647 = vrot.lane.b32.xlu1 %v3700_v48, %s3308_s2 }
 0x4bc   : > { %v1477_v9 = vpop.xlane.xlu0 %1476 }
 0x4bd   : > { %v1481_v11 = vsub.f32 %v1418_v58, %v1477_v9 }
 0x4bf   : > { %v1483_v12 = vmul.f32 1.442695, %v1481_v11 }
 0x4c1   : > { %3066 = vpow2.f32 %v1483_v12 }
 0x4c4   : > { %v1480_v13 = vpop.xlane.xlu1 %1479 }
 0x4c5   : > { %v1482_v14 = vsub.f32 %v1470_v4, %v1480_v13 }
 0x4c7   : > { %v1485_v15 = vmul.f32 1.442695, %v1482_v14 }
 0x4c8   : > { %v1550_v16 = vpop.permute.xlu1 %1549 }
 0x4c9   : > { %3068 = vpow2.f32 %v1485_v15  ;;  %v1555_v17 = vsel %vm1281_vm5, %v1550_v16, 0 }
 0x4ca   : > { %2862 = vmatpush3.bf16.msra.mxu1 %v1555_v17 }
 0x4cb   : > { %2873 = vmatprep.subr.bf16.mxu1 %v3304_v10 }
 0x4cc   : > { %v1600_v32 = vpop.permute.xlu1 %1599 }
 0x4cd   : > { %v1605_v35 = vsel %vm1159_vm3, %v1600_v32, 0 }
 0x4ce   : > { %v3067_v18 = vpop.eup %3066 }
 0x4cf   : > { %v1487_v19 = vsel %vm1159_vm3, %v3067_v18, 0.0 }
 0x4d0   : > { %1488 = vadd.xlane.f32.xlu0 %v1487_v19  ;;  %v1650_v38 = vpop.permute.xlu1 %1649 }
 0x4d1   : > { %v1655_v41 = vsel %vm1159_vm3, %v1650_v38, 0 }
 0x4d4   : > { %v1648_v43 = vpop.permute.xlu1 %1647 }
 0x4d6   : > { %v3069_v20 = vpop.eup %3068 }
 0x4d7   : > { %v1490_v21 = vsel %vm1159_vm3, %v3069_v20, 0.0 }
 0x4d8   : > { %1491 = vadd.xlane.f32.xlu0 %v1490_v21 }
 0x4ee   : > { %1500 = vrot.lane.b32.xlu0 %v3732_v27, %s3306_s27 }
 0x4f2   : > { %1597 = vrot.lane.b32.xlu0 %v3689_v44, %s3308_s2 }
 0x559   : > { %v1489_v22 = vpop.xlane.xlu0 %1488 }
 0x55a   : > { %3070 = vrcp.f32 %v1489_v22 }
 0x561   : > { %v1492_v23 = vpop.xlane.xlu0 %1491 }
 0x562   : > { %3072 = vrcp.f32 %v1492_v23 }
 0x565   : > { %v1501_v26 = vpop.permute.xlu0 %1500 }
 0x566   : > { %v1506_v28 = vsel %vm1281_vm5, %v1501_v26, 0 }
 0x567   : > { %v3071_v29 = vpop.eup %3070  ;;  %2856 = vmatpush3.bf16.msra.mxu0 %v1506_v28 }
 0x568   : > { %2867 = vmatprep.subr.bf16.mxu0 %v3304_v10  ;;  %v1495_v30 = vmul.f32 %v3071_v29, %v3067_v18 }
 0x569   : > { %v1598_v40 = vpop.permute.xlu0 %1597 }
 0x56a   : > { %v1497_v33 = vpack.c.bf16 %v1495_v30, %v1495_v30 }
 0x56c   : > { %2858 = vmatmul.mubr.msk.bf16.vlgmr.msra.gmra.mxu0 %vm1159_vm3, %v1497_v33 }
 0x56d   : > { %2868 = vmatpush3.bf16.xpose.msra.mxu0 %v1605_v35  ;;  %2869 = vmatprep.mubr.msk.bf16.mxu0 %vm3305_vm2, %v3304_v10 }
 0x56e   : > { %2879 = vmatprep.subr.bf16.mxu0 %v3304_v10 }
 0x56f   : > { %v3073_v36 = vpop.eup %3072 }
 0x570   : > { %v1496_v37 = vmul.f32 %v3073_v36, %v3069_v20 }
 0x572   : > { %v1498_v39 = vpack.c.bf16 %v1496_v37, %v1496_v37 }
 0x574   : > { %2864 = vmatmul.mubr.msk.bf16.vlgmr.msra.gmra.mxu1 %vm1159_vm3, %v1498_v39  ;;  %2870 = vmatmul.mubr.msk.bf16.vlgmr.msra.gmra.mxu0 %vm1159_vm3, %v1598_v40 }
 0x575   : > { %2874 = vmatpush3.bf16.xpose.msra.mxu1 %v1655_v41  ;;  %2875 = vmatprep.mubr.msk.bf16.mxu1 %vm3305_vm2, %v3304_v10 }
 0x576   : > { %2885 = vmatprep.subr.bf16.mxu1 %v3304_v10  ;;  %2881 = vmatprep.mubr.msk.bf16.mxu0 %vm3305_vm2, %v3304_v10 }
 0x57c   : > { %2876 = vmatmul.mubr.msk.bf16.vlgmr.msra.gmra.mxu1 %vm1159_vm3, %v1648_v43 }
 0x57d   : > { %2887 = vmatprep.mubr.msk.bf16.mxu1 %vm3305_vm2, %v3304_v10 }
 0x62c   : > { %v3804_v45 = vpop.f32.mrf.mxu0 }
 0x62e   : > { %v2859_v46 = vpop.f32.mrf.mxu0 }
 0x630   : > { %v1545_v47 = vpop.f32.mrf.mxu0 }
 0x632   : > { %v2860_v49 = vpop.f32.mrf.mxu0 }
 0x634   : > { %v3806_v50 = vpop.f32.mrf.mxu1  ;;  %v1641_v51 = vpop.f32.mrf.mxu0 }
 0x635   : > { %v3043_v53 = vpack.i.bf16 %v3806_v50, %v3804_v45  ;;  %v1642_v54 = vadd.f32 %v1641_v51, %v3717_v61 }
 0x636   : > { %v2865_v55 = vpop.f32.mrf.mxu1  ;;  %v2871_v57 = vpop.f32.mrf.mxu0 }
 0x637   : > { %v1697_v58 = vsel %vm1159_vm3, %v1642_v54, -inf }
 0x638   : > { %v1594_v59 = vpop.f32.mrf.mxu1  ;;  %1698 = vmax.xlane.f32.xlu0 %v1697_v58  ;;  %v1644_v60 = vpop.f32.mrf.mxu0 }
 0x63a   : > { %v2866_v62 = vpop.f32.mrf.mxu1  ;;  %v2872_v63 = vpop.f32.mrf.mxu0 }
 0x63c   : > { %v1691_v0 = vpop.f32.mrf.mxu1 }
 0x63d   : > { %v1692_v1 = vadd.f32 %v1691_v0, %v3717_v61 }
 0x63e   : > { %v2877_v2 = vpop.f32.mrf.mxu1 }
 0x63f   : > { %v1700_v3 = vsel %vm1159_vm3, %v1692_v1, -inf }
 0x640   : > { %1701 = vmax.xlane.f32.xlu1 %v1700_v3  ;;  %v1694_v4 = vpop.f32.mrf.mxu1 }
 0x642   : > { %v2878_v5 = vpop.f32.mrf.mxu1 }
 0x651   : > { %1769 = vrot.lane.b32.xlu1 %v3734_v31, %s3308_s2 }
 0x655   : > { %1819 = vrot.lane.b32.xlu1 %v3682_v34, %s3309_s18 }
 0x659   : > { %1869 = vrot.lane.b32.xlu1 %v3686_v42, %s3309_s18 }
 0x65d   : > { %1867 = vrot.lane.b32.xlu1 %v3700_v48, %s3309_s18 }
 0x6c1   : > { %v1699_v6 = vpop.xlane.xlu0 %1698 }
 0x6c2   : > { %v1703_v7 = vsub.f32 %v1642_v54, %v1699_v6 }
 0x6c4   : > { %v1705_v8 = vmul.f32 1.442695, %v1703_v7 }
 0x6c6   : > { %3074 = vpow2.f32 %v1705_v8 }
 0x6c9   : > { %v1702_v9 = vpop.xlane.xlu1 %1701 }
 0x6ca   : > { %v1704_v11 = vsub.f32 %v1692_v1, %v1702_v9 }
 0x6cc   : > { %v1707_v12 = vmul.f32 1.442695, %v1704_v11 }
 0x6cd   : > { %v1770_v13 = vpop.permute.xlu1 %1769 }
 0x6ce   : > { %3076 = vpow2.f32 %v1707_v12  ;;  %v1775_v14 = vsel %vm1281_vm5, %v1770_v13, 0 }
 0x6cf   : > { %2886 = vmatpush3.bf16.msra.mxu1 %v1775_v14 }
 0x6d0   : > { %2897 = vmatprep.subr.bf16.mxu1 %v3304_v10 }
 0x6d1   : > { %v1820_v22 = vpop.permute.xlu1 %1819 }
 0x6d2   : > { %v1825_v26 = vsel %vm1159_vm3, %v1820_v22, 0 }
 0x6d3   : > { %v3075_v34 = vpop.eup %3074 }
 0x6d4   : > { %v1709_v42 = vsel %vm1159_vm3, %v3075_v34, 0.0 }
 0x6d5   : > { %1710 = vadd.xlane.f32.xlu0 %v1709_v42  ;;  %v1870_v29 = vpop.permute.xlu1 %1869 }
 0x6d6   : > { %v1875_v33 = vsel %vm1159_vm3, %v1870_v29, 0 }
 0x6d9   : > { %v1868_v35 = vpop.permute.xlu1 %1867 }
 0x6db   : > { %v3077_v15 = vpop.eup %3076 }
 0x6dc   : > { %v1712_v48 = vsel %vm1159_vm3, %v3077_v15, 0.0 }
 0x6dd   : > { %1713 = vadd.xlane.f32.xlu0 %v1712_v48 }
 0x6f3   : > { %1721 = vrot.lane.b32.xlu0 %v3732_v27, %s3308_s2 }
 0x6f7   : > { %1817 = vrot.lane.b32.xlu0 %v3689_v44, %s3309_s18 }
 0x75e   : > { %v1711_v16 = vpop.xlane.xlu0 %1710 }
 0x75f   : > { %3078 = vrcp.f32 %v1711_v16  ;;  %v2071_v16 = vld [vmem:[%s4091_s17 + $0x10] sm:$0xff] }
 0x766   : > { %v1714_v17 = vpop.xlane.xlu0 %1713 }
 0x767   : > { %3080 = vrcp.f32 %v1714_v17  ;;  %v2072_v17 = vld [vmem:[%s4091_s17 + $0x18] sm:$0xff] }
 0x76a   : > { %v1722_v18 = vpop.permute.xlu0 %1721 }
 0x76b   : > { %v1727_v19 = vsel %vm1281_vm5, %v1722_v18, 0  ;;  %v2075_v18 = vpack.c.bf16 %v2072_v17, %v2071_v16  ;;  %v2183_v16 = vld [vmem:[%s3613_s30 + $0x18] sm:$0xff] }
 0x76c   : > { %v3079_v20 = vpop.eup %3078  ;;  %2880 = vmatpush3.bf16.msra.mxu0 %v1727_v19  ;;  %v2069_v19 = vld [vmem:[%s4091_s17] sm:$0xff] }
 0x76d   : > { %2891 = vmatprep.subr.bf16.mxu0 %v3304_v10  ;;  %v1717_v21 = vmul.f32 %v3079_v20, %v3075_v34  ;;  %v2070_v20 = vld [vmem:[%s4091_s17 + $0x8] sm:$0xff] }
 0x76e   : > { %v1818_v32 = vpop.permute.xlu0 %1817  ;;  %v2074_v22 = vpack.c.bf16 %v2070_v20, %v2069_v19  ;;  %v2180_v19 = vld [vmem:[%s3613_s30] sm:$0xff]  ;;  %v2181_v20 = vld [vmem:[%s3613_s30 + $0x8] sm:$0xff] }
 0x76f   : > { %v1719_v23 = vpack.c.bf16 %v1717_v21, %v1717_v21  ;;  %v2090_v21 = vsel %vm976_vm1, %v2075_v18, 0 }
 0x771   : > { %2882 = vmatmul.mubr.msk.bf16.vlgmr.msra.gmra.mxu0 %vm1159_vm3, %v1719_v23  ;;  %v2087_v23 = vsel %vm976_vm1, %v2074_v22, 0 }
 0x772   : > { %2892 = vmatpush3.bf16.xpose.msra.mxu0 %v1825_v26  ;;  %2893 = vmatprep.mubr.msk.bf16.mxu0 %vm3305_vm2, %v3304_v10 }
 0x773   : > { %2903 = vmatprep.subr.bf16.mxu0 %v3304_v10 }
 0x774   : > { %v3081_v44 = vpop.eup %3080 }
 0x775   : > { %v1718_v28 = vmul.f32 %v3081_v44, %v3077_v15 }
 0x777   : > { %v1720_v30 = vpack.c.bf16 %v1718_v28, %v1718_v28 }
 0x779   : > { %2888 = vmatmul.mubr.msk.bf16.vlgmr.msra.gmra.mxu1 %vm1159_vm3, %v1720_v30  ;;  %2894 = vmatmul.mubr.msk.bf16.vlgmr.msra.gmra.mxu0 %vm1159_vm3, %v1818_v32 }
 0x77a   : > { %2898 = vmatpush3.bf16.xpose.msra.mxu1 %v1875_v33  ;;  %2899 = vmatprep.mubr.msk.bf16.mxu1 %vm3305_vm2, %v3304_v10 }
 0x77b   : > { %2909 = vmatprep.subr.bf16.mxu1 %v3304_v10  ;;  %2905 = vmatprep.mubr.msk.bf16.mxu0 %vm3305_vm2, %v3304_v10 }
 0x781   : > { %2900 = vmatmul.mubr.msk.bf16.vlgmr.msra.gmra.mxu1 %vm1159_vm3, %v1868_v35 }
 0x782   : > { %2911 = vmatprep.mubr.msk.bf16.mxu1 %vm3305_vm2, %v3304_v10 }
 0x831   : > { %v1763_v36 = vpop.f32.mrf.mxu0 }
 0x833   : > { %v2883_v37 = vpop.f32.mrf.mxu0 }
 0x835   : > { %v1766_v38 = vpop.f32.mrf.mxu0 }
 0x837   : > { %v2884_v39 = vpop.f32.mrf.mxu0 }
 0x839   : > { %v1811_v40 = vpop.f32.mrf.mxu1  ;;  %v1861_v41 = vpop.f32.mrf.mxu0 }
 0x83a   : > { %v1862_v43 = vadd.f32 %v1861_v41, %v3717_v61  ;;  %v3048_v1 = vpack.i.bf16 %v1811_v40, %v1763_v36 }
 0x83b   : > { %v2889_v46 = vpop.f32.mrf.mxu1  ;;  %v2895_v47 = vpop.f32.mrf.mxu0 }
 0x83c   : > { %v1917_v49 = vsel %vm1159_vm3, %v1862_v43, -inf }
 0x83d   : > { %v1814_v51 = vpop.f32.mrf.mxu1  ;;  %1918 = vmax.xlane.f32.xlu0 %v1917_v49  ;;  %v1864_v54 = vpop.f32.mrf.mxu0 }
 0x83f   : > { %v2890_v55 = vpop.f32.mrf.mxu1  ;;  %v2896_v57 = vpop.f32.mrf.mxu0 }
 0x841   : > { %v1911_v58 = vpop.f32.mrf.mxu1 }
 0x842   : > { %v1912_v59 = vadd.f32 %v1911_v58, %v3717_v61 }
 0x843   : > { %v2901_v60 = vpop.f32.mrf.mxu1 }
 0x844   : > { %v1920_v62 = vsel %vm1159_vm3, %v1912_v59, -inf }
 0x845   : > { %1921 = vmax.xlane.f32.xlu1 %v1920_v62  ;;  %v1914_v63 = vpop.f32.mrf.mxu1 }
 0x847   : > { %v2902_v0 = vpop.f32.mrf.mxu1 }
 0x856   : > { %1989 = vrot.lane.b32.xlu1 %v3734_v31, %s3309_s18 }
 0x85a   : > { %3044 = vrot.lane.b32.xlu1 %v3043_v53, %s3310_s1 }
 0x85e   : > { %3049 = vrot.lane.b32.xlu1 %v3048_v1, %s3311_s20 }
 0x8c6   : > { %v1919_v2 = vpop.xlane.xlu0 %1918 }
 0x8c7   : > { %v1923_v61 = vsub.f32 %v1862_v43, %v1919_v2 }
 0x8c9   : > { %v1925_v3 = vmul.f32 1.442695, %v1923_v61 }
 0x8cb   : > { %3082 = vpow2.f32 %v1925_v3 }
 0x8ce   : > { %v1922_v4 = vpop.xlane.xlu1 %1921 }
 0x8cf   : > { %v1924_v5 = vsub.f32 %v1912_v59, %v1922_v4 }
 0x8d1   : > { %v1927_v6 = vmul.f32 1.442695, %v1924_v5 }
 0x8d2   : > { %v1990_v7 = vpop.permute.xlu1 %1989 }
 0x8d3   : > { %3084 = vpow2.f32 %v1927_v6  ;;  %v1995_v31 = vsel %vm1281_vm5, %v1990_v7, 0  ;;  %v2186_v6 = vld [vmem:[%s3613_s30 + $0x30] sm:$0xff]  ;;  %v2187_v7 = vld [vmem:[%s3613_s30 + $0x38] sm:$0xff] }
 0x8d4   : > { %2910 = vmatpush3.bf16.msra.mxu1 %v1995_v31  ;;  %v2192_v31 = vpack.c.bf16 %v2187_v7, %v2186_v6 }
 0x8d5   : > { %2923 = vmatprep.subr.bf16.mxu1 %v3304_v10 }
 0x8d6   : > { %v3045_v37 = vpop.permute.xlu1 %3044 }
 0x8d7   : > { %v3047_v39 = vunpack.i.h.bf16 %v3045_v37  ;;  %v3046_v40 = vunpack.i.l.bf16 %v3045_v37 }
 0x8d8   : > { %v3083_v8 = vpop.eup %3082 }
 0x8d9   : > { %v1929_v45 = vsel %vm1159_vm3, %v3083_v8, 0.0  ;;  %v2062_v47 = vsel %vm1159_vm3, %v3764_v56, %v3047_v39  ;;  %v2061_v49 = vsel %vm1159_vm3, %v3762_v52, %v3046_v40  ;;  %v2720_v56 = vld [vmem:[%s4093_s22] ss:$0 sm:$0xff] }
 0x8da   : > { %1930 = vadd.xlane.f32.xlu0 %v1929_v45  ;;  %v3050_v38 = vpop.permute.xlu1 %3049  ;;  %v2722_v39 = vld [vmem:[%s934_s3] ss:$0 sm:$0xff] }
 0x8db   : > { %v3052_v41 = vunpack.i.h.bf16 %v3050_v38  ;;  %v3051_v43 = vunpack.i.l.bf16 %v3050_v38 }
 0x8dd   : > { %v2065_v55 = vsel %vm2063_vm6, %v2062_v47, %v3052_v41  ;;  %v2064_v57 = vsel %vm2063_vm6, %v2061_v49, %v3051_v43  ;;  %v2723_v43 = vld [vmem:[%s937_s9] ss:$0 sm:$0xff] }
 0x8e0   : > { %v3085_v50 = vpop.eup %3084 }
 0x8e1   : > { %v1932_v53 = vsel %vm1159_vm3, %v3085_v50, 0.0 }
 0x8e2   : > { %1933 = vadd.xlane.f32.xlu0 %v1932_v53 }
 0x8f8   : > { %1941 = vrot.lane.b32.xlu0 %v3732_v27, %s3309_s18 }
 0x963   : > { %v1931_v9 = vpop.xlane.xlu0 %1930 }
 0x964   : > { %3086 = vrcp.f32 %v1931_v9 }
 0x96b   : > { %v1934_v11 = vpop.xlane.xlu0 %1933 }
 0x96c   : > { %3088 = vrcp.f32 %v1934_v11 }
 0x96f   : > { %v1942_v12 = vpop.permute.xlu0 %1941 }
 0x970   : > { %v1947_v13 = vsel %vm1281_vm5, %v1942_v12, 0 }
 0x971   : > { %v3087_v14 = vpop.eup %3086  ;;  %2904 = vmatpush3.bf16.msra.mxu0 %v1947_v13 }
 0x972   : > { %v1937_v34 = vmul.f32 %v3087_v14, %v3083_v8  ;;  %2915 = vmatprep.subr.bf16.mxu0 %v3304_v10  ;;  %v2213_v8 = vsel %vm976_vm1, %v2192_v31, 0 }
 0x974   : > { %v1939_v42 = vpack.c.bf16 %v1937_v34, %v1937_v34  ;;  %v2184_v34 = vld [vmem:[%s3613_s30 + $0x20] sm:$0xff] }
 0x976   : > { %2906 = vmatmul.mubr.msk.bf16.vlgmr.msra.gmra.mxu0 %vm1159_vm3, %v1939_v42  ;;  %v2185_v42 = vld [vmem:[%s3613_s30 + $0x28] sm:$0xff] }
 0x977   : > { %2919 = vmatprep.mubr.msk.bf16.mxu0 %vm3305_vm2, %v3304_v10  ;;  %2916 = vmatpush3.bf16.xpose.msra.mxu0 %v2090_v21  ;;  %v2189_v21 = vpack.c.bf16 %v2181_v20, %v2180_v19 }
 0x978   : > { %2917 = vmatprep.subr.bf16.mxu0 %v3304_v10 }
 0x979   : > { %v3089_v27 = vpop.eup %3088  ;;  %v2204_v22 = vsel %vm976_vm1, %v2189_v21, 0 }
 0x97a   : > { %v1938_v15 = vmul.f32 %v3089_v27, %v3085_v50  ;;  %v2191_v27 = vpack.c.bf16 %v2185_v42, %v2184_v34 }
 0x97c   : > { %v1940_v48 = vpack.c.bf16 %v1938_v15, %v1938_v15  ;;  %v2210_v15 = vsel %vm976_vm1, %v2191_v27, 0 }
 0x97e   : > { %2912 = vmatmul.mubr.msk.bf16.vlgmr.msra.gmra.mxu1 %vm1159_vm3, %v1940_v48  ;;  %v2182_v48 = vld [vmem:[%s3613_s30 + $0x10] sm:$0xff] }
 0x97f   : > { %2931 = vmatprep.mubr.msk.bf16.mxu1 %vm3305_vm2, %v3304_v10  ;;  %2918 = vmatpush3.bf16.xpose.msra.mxu0 %v2087_v23  ;;  %v2190_v17 = vpack.c.bf16 %v2183_v16, %v2182_v48  ;;  %v2260_v23 = vld [vmem:[%s3635_s16 + $0x10] sm:$0xff] }
 0x980   : > { %2935 = vmatprep.subr.bf16.mxu0 %v3304_v10  ;;  %2924 = vmatpush3.bf16.xpose.msra.mxu1 %v2213_v8 }
 0x981   : > { %2925 = vmatprep.subr.bf16.mxu1 %v3304_v10  ;;  %v2207_v18 = vsel %vm976_vm1, %v2190_v17, 0 }
 0x988   : > { %2926 = vmatpush3.bf16.xpose.msra.mxu1 %v2210_v15 }
 0x989   : > { %2927 = vmatprep.subr.bf16.mxu1 %v3304_v10 }
 0x990   : > { %2928 = vmatpush3.bf16.xpose.msra.mxu1 %v2207_v18 }
 0x991   : > { %2929 = vmatprep.subr.bf16.mxu1 %v3304_v10 }
 0x998   : > { %2930 = vmatpush3.bf16.xpose.msra.mxu1 %v2204_v22  ;;  %v2728_v22 = vld [vmem:[%s940_s19] ss:$0 sm:$0xff]  ;;  %s4101_s19 = sld [smem:[#allocation38_spill]] (!%p2730_p12) }
 0xa36   : > { %v1983_v26 = vpop.f32.mrf.mxu0 }
 0xa38   : > { %v2907_v44 = vpop.f32.mrf.mxu0 }
 0xa3a   : > { %v1986_v28 = vpop.f32.mrf.mxu0 }
 0xa3c   : > { %v2908_v29 = vpop.f32.mrf.mxu0 }
 0xa3e   : > { %v2031_v30 = vpop.f32.mrf.mxu1 }
 0xa3f   : > { %v3053_v32 = vpack.i.bf16 %v2031_v30, %v1983_v26  ;;  %v2261_v26 = vld [vmem:[%s3635_s16 + $0x18] sm:$0xff] }
 0xa40   : > { %v2913_v33 = vpop.f32.mrf.mxu1  ;;  %v2264_v44 = vpack.c.bf16 %v2261_v26, %v2260_v23  ;;  %v2729_v26 = vld [vmem:[%s943_s13] ss:$0 sm:$0xff] }
 0xa41   : > { %3054 = vrot.lane.b32.xlu0 %v3053_v32, %s3312_s10 }
 0xa42   : > { %v2034_v35 = vpop.f32.mrf.mxu1  ;;  %v2280_v28 = vsel %vm2272_vm8, %v2264_v44, 0 }
 0xa44   : > { %v2914_v36 = vpop.f32.mrf.mxu1 }
 0xab3   : > { %v3055_v46 = vpop.permute.xlu0 %3054 }
 0xab4   : > { %v3057_v51 = vunpack.i.h.bf16 %v3055_v46  ;;  %v3056_v54 = vunpack.i.l.bf16 %v3055_v46 }
 0xab6   : > { %v2068_v58 = vsel %vm2066_vm7, %v2065_v55, %v3057_v51  ;;  %v2067_v59 = vsel %vm2066_vm7, %v2064_v57, %v3056_v54  ;;  %v2258_v54 = vld [vmem:[%s3635_s16] sm:$0xff]  ;;  %v2259_v55 = vld [vmem:[%s3635_s16 + $0x8] sm:$0xff] }
 0xab7   : > { %v2073_v60 = vpack.c.bf16 %v2068_v58, %v2067_v59  ;;  %v2263_v57 = vpack.c.bf16 %v2259_v55, %v2258_v54  ;;  %v2724_v59 = vld [vmem:[%s4097_s11] ss:$0 sm:$0xff] }
 0xab9   : > { %2920 = vmatmul.mubr.msk.bf16.vlgmr.msra.gmra.mxu0 %vm976_vm1, %v2073_v60  ;;  %v2277_v58 = vsel %vm2272_vm8, %v2263_v57, 0 }
 0xaba   : > { %2939 = vmatprep.mubr.msk.bf16.mxu0 %vm3305_vm2, %v3304_v10  ;;  %2936 = vmatpush3.bf16.xpose.msra.mxu0 %v2280_v28 }
 0xabb   : > { %2937 = vmatprep.subr.bf16.mxu0 %v3304_v10 }
 0xac2   : > { %2938 = vmatpush3.bf16.xpose.msra.mxu0 %v2277_v58 }
 0xb79   : > { %v2126_v52 = vpop.f32.mrf.mxu0 }
 0xb7a   : > { %v2127_v62 = vadd.f32 %v2720_v56, %v2126_v52 }
 0xb7b   : > { %v2921_v63 = vpop.f32.mrf.mxu0 }
 0xb7c   : > { %v2133_v0 = vadd.f32 %v2127_v62, %v3658_v24 }
 0xb7d   : > { %v2129_v1 = vpop.f32.mrf.mxu0 }
 0xb7e   : > { %v2130_v2 = vadd.f32 %v2720_v56, %v2129_v1  ;;  %v2137_v61 = vsel %vm976_vm1, %v2133_v0, 0.0 }
 0xb7f   : > { %2138 = vadd.xlane.f32.xlu1 %v2137_v61  ;;  %v2922_v3 = vpop.f32.mrf.mxu0 }
 0xb80   : > { %v2134_v4 = vadd.f32 %v2130_v2, %v3660_v25  ;;  %v2726_v3 = vld [vmem:[%s931_s25] ss:$0 sm:$0xff] }
 0xb82   : > { %v2140_v5 = vsel %vm976_vm1, %v2134_v4, 0.0 }
 0xb83   : > { %2141 = vadd.xlane.f32.xlu0 %v2140_v5 }
 0xc08   : > { %v2139_v24 = vpop.xlane.xlu1 %2138 }
 0xc09   : > { %v2144_v45 = vmul.f32 0.03125, %v2139_v24 }
 0xc0b   : > { %v2146_v50 = vsub.f32 %v2133_v0, %v2144_v45 }
 0xc0c   : > { %v2142_v53 = vpop.xlane.xlu0 %2141 }
 0xc0d   : > { %v2145_v25 = vmul.f32 0.03125, %v2142_v53  ;;  %v2148_v9 = vmul.f32 %v2146_v50, %v2146_v50 }
 0xc0f   : > { %v2147_v11 = vsub.f32 %v2134_v4, %v2145_v25  ;;  %v2150_v12 = vsel %vm976_vm1, %v2148_v9, 0.0 }
 0xc10   : > { %2151 = vadd.xlane.f32.xlu0 %v2150_v12 }
 0xc11   : > { %v2149_v13 = vmul.f32 %v2147_v11, %v2147_v11 }
 0xc13   : > { %v2153_v14 = vsel %vm976_vm1, %v2149_v13, 0.0 }
 0xc14   : > { %2154 = vadd.xlane.f32.xlu0 %v2153_v14 }
 0xc99   : > { %v2152_v29 = vpop.xlane.xlu0 %2151 }
 0xc9a   : > { %v2156_v30 = vmul.f32 0.03125, %v2152_v29 }
 0xc9c   : > { %v2158_v32 = vadd.f32 1e-05, %v2156_v30 }
 0xc9d   : > { %v2155_v33 = vpop.xlane.xlu0 %2154 }
 0xc9e   : > { %3090 = vrsqrt.f32 %v2158_v32  ;;  %v2157_v35 = vmul.f32 0.03125, %v2155_v33 }
 0xca0   : > { %v2159_v36 = vadd.f32 1e-05, %v2157_v35 }
 0xca2   : > { %3092 = vrsqrt.f32 %v2159_v36 }
 0xcab   : > { %v3091_v37 = vpop.eup %3090 }
 0xcac   : > { %v2162_v38 = vmul.f32 %v3091_v37, %v2146_v50 }
 0xcae   : > { %v2170_v41 = vmul.f32 %v2722_v39, %v2162_v38 }
 0xcaf   : > { %v3093_v40 = vpop.eup %3092 }
 0xcb0   : > { %v2163_v10 = vmul.f32 %v3093_v40, %v2147_v11  ;;  %v2178_v47 = vadd.f32 %v2723_v43, %v2170_v41 }
 0xcb2   : > { %v2171_v46 = vmul.f32 %v2722_v39, %v2163_v10 }
 0xcb4   : > { %v2179_v49 = vadd.f32 %v2723_v43, %v2171_v46 }
 0xcb6   : > { %v2188_v51 = vpack.c.bf16 %v2179_v49, %v2178_v47 }
 0xcb8   : > { %2932 = vmatmul.mubr.msk.bf16.vlgmr.msra.gmra.mxu1 %vm976_vm1, %v2188_v51 }
 0xd78   : > { %v2249_v60 = vpop.f32.mrf.mxu1 }
 0xd79   : > { %v2250_v52 = vadd.f32 %v2724_v59, %v2249_v60 }
 0xd7a   : > { %v2933_v56 = vpop.f32.mrf.mxu1 }
 0xd7b   : > { %v2256_v1 = vmax.f32 %v2250_v52, 0.0 }
 0xd7c   : > { %v2252_v62 = vpop.f32.mrf.mxu1 }
 0xd7d   : > { %v2253_v63 = vadd.f32 %v2724_v59, %v2252_v62 }
 0xd7e   : > { %v2934_v0 = vpop.f32.mrf.mxu1 }
 0xd7f   : > { %v2257_v2 = vmax.f32 %v2253_v63, 0.0 }
 0xd81   : > { %v2262_v61 = vpack.c.bf16 %v2257_v2, %v2256_v1 }
 0xd83   : > { %2940 = vmatmul.mubr.msk.bf16.vlgmr.msra.gmra.mxu0 %vm2272_vm8, %v2262_v61 }
 0xe43   : > { %v2316_v4 = vpop.f32.mrf.mxu0 }
 0xe44   : > { %v2317_v5 = vadd.f32 %v2726_v3, %v2316_v4 }
 0xe45   : > { %v2941_v6 = vpop.f32.mrf.mxu0 }
 0xe46   : > { %v2323_v7 = vadd.f32 %v2317_v5, %v2178_v47 }
 0xe47   : > { %v2319_v31 = vpop.f32.mrf.mxu0 }
 0xe48   : > { %v2320_v8 = vadd.f32 %v2726_v3, %v2319_v31  ;;  %v2327_v24 = vsel %vm976_vm1, %v2323_v7, 0.0 }
 0xe49   : > { %2328 = vadd.xlane.f32.xlu1 %v2327_v24  ;;  %v2942_v45 = vpop.f32.mrf.mxu0 }
 0xe4a   : > { %v2324_v50 = vadd.f32 %v2320_v8, %v2179_v49 }
 0xe4c   : > { %v2330_v53 = vsel %vm976_vm1, %v2324_v50, 0.0 }
 0xe4d   : > { %2331 = vadd.xlane.f32.xlu0 %v2330_v53 }
 0xed2   : > { %v2329_v25 = vpop.xlane.xlu1 %2328 }
 0xed3   : > { %v2333_v9 = vmul.f32 0.03125, %v2329_v25 }
 0xed5   : > { %v2335_v11 = vsub.f32 %v2323_v7, %v2333_v9 }
 0xed6   : > { %v2332_v12 = vpop.xlane.xlu0 %2331 }
 0xed7   : > { %v2334_v13 = vmul.f32 0.03125, %v2332_v12  ;;  %v2337_v14 = vmul.f32 %v2335_v11, %v2335_v11 }
 0xed9   : > { %v2336_v34 = vsub.f32 %v2324_v50, %v2334_v13  ;;  %v2339_v42 = vsel %vm976_vm1, %v2337_v14, 0.0 }
 0xeda   : > { %2340 = vadd.xlane.f32.xlu1 %v2339_v42 }
 0xedb   : > { %v2338_v27 = vmul.f32 %v2336_v34, %v2336_v34 }
 0xedd   : > { %v2342_v15 = vsel %vm976_vm1, %v2338_v27, 0.0 }
 0xede   : > { %2343 = vadd.xlane.f32.xlu0 %v2342_v15 }
 0xf63   : > { %v2341_v48 = vpop.xlane.xlu1 %2340 }
 0xf64   : > { %v2345_v16 = vmul.f32 0.03125, %v2341_v48 }
 0xf66   : > { %v2347_v17 = vadd.f32 1e-05, %v2345_v16 }
 0xf67   : > { %v2344_v18 = vpop.xlane.xlu0 %2343 }
 0xf68   : > { %3094 = vrsqrt.f32 %v2347_v17  ;;  %v2346_v19 = vmul.f32 0.03125, %v2344_v18 }
 0xf6a   : > { %v2348_v20 = vadd.f32 1e-05, %v2346_v19 }
 0xf6c   : > { %3096 = vrsqrt.f32 %v2348_v20 }
 0xf75   : > { %v3095_v21 = vpop.eup %3094 }
 0xf76   : > { %v2351_v23 = vmul.f32 %v3095_v21, %v2335_v11 }
 0xf78   : > { %v2359_v44 = vmul.f32 %v2728_v22, %v2351_v23 }
 0xf79   : > { %v3097_v28 = vpop.eup %3096 }
 0xf7a   : > { %v2367_v29 = vadd.f32 %v2729_v26, %v2359_v44  ;;  %v2352_v30 = vmul.f32 %v3097_v28, %v2336_v34 }
 0xf7c   : > { %2369 = vst.msk [vmem:[#allocation2] sm:$0xff] %vm976_vm1, %v2367_v29  ;;  %v2360_v32 = vmul.f32 %v2728_v22, %v2352_v30  ;;  %2374 = sbr.rel (%p2730_p12) target bundleno = 4282 (0x10ba), region = 124 }
 0xf7e   : > { %v2368_v33 = vadd.f32 %v2729_v26, %v2360_v32 }
 0xf80   : > { %2370 = vst.msk [vmem:[#allocation2 + $0x8] sm:$0xff] %vm976_vm1, %v2368_v33 }
 0xf81   : > { %v2377_v35 = vsel %vm976_vm1, %v2367_v29, 0.0  ;;  %v2380_v36 = vsel %vm976_vm1, %v2368_v33, 0.0  ;;  %v2731_v56 = vld [vmem:[%s4101_s19] ss:$0 sm:$0xff] }
 0xf82   : > { %2378 = vadd.xlane.f32.xlu0 %v2377_v35  ;;  %v2732_v62 = vld [vmem:[%s4102_s26] ss:$0 sm:$0xff] }
 0xf86   : > { %2381 = vadd.xlane.f32.xlu0 %v2380_v36 }
0x100b   : > { %v2379_v37 = vpop.xlane.xlu0 %2378 }
0x100c   : > { %v2383_v38 = vmul.f32 0.03125, %v2379_v37 }
0x100e   : > { %v2385_v39 = vsub.f32 %v2367_v29, %v2383_v38 }
0x100f   : > { %v2382_v40 = vpop.xlane.xlu0 %2381 }
0x1010   : > { %v2384_v10 = vmul.f32 0.03125, %v2382_v40  ;;  %v2387_v41 = vmul.f32 %v2385_v39, %v2385_v39 }
0x1012   : > { %v2386_v43 = vsub.f32 %v2368_v33, %v2384_v10  ;;  %v2389_v46 = vsel %vm976_vm1, %v2387_v41, 0.0 }
0x1013   : > { %2390 = vadd.xlane.f32.xlu1 %v2389_v46 }
0x1014   : > { %v2388_v47 = vmul.f32 %v2386_v43, %v2386_v43 }
0x1016   : > { %v2392_v49 = vsel %vm976_vm1, %v2388_v47, 0.0 }
0x1017   : > { %2393 = vadd.xlane.f32.xlu1 %v2392_v49 }
0x109c   : > { %v2391_v51 = vpop.xlane.xlu1 %2390 }
0x109d   : > { %v2395_v54 = vmul.f32 0.03125, %v2391_v51 }
0x109f   : > { %v2397_v55 = vadd.f32 1e-05, %v2395_v54 }
0x10a0   : > { %v2394_v57 = vpop.xlane.xlu1 %2393 }
0x10a1   : > { %3098 = vrsqrt.f32 %v2397_v55  ;;  %v2396_v58 = vmul.f32 0.03125, %v2394_v57 }
0x10a3   : > { %v2398_v59 = vadd.f32 1e-05, %v2396_v58 }
0x10a5   : > { %3100 = vrsqrt.f32 %v2398_v59 }
0x10ae   : > { %v3099_v60 = vpop.eup %3098 }
0x10af   : > { %v2401_v52 = vmul.f32 %v3099_v60, %v2385_v39 }
0x10b1   : > { %v2409_v63 = vmul.f32 %v2731_v56, %v2401_v52 }
0x10b2   : > { %v3101_v0 = vpop.eup %3100 }
0x10b3   : > { %v2417_v1 = vadd.f32 %v2732_v62, %v2409_v63  ;;  %v2402_v2 = vmul.f32 %v3101_v0, %v2386_v43 }
0x10b5   : > { %2419 = vst.msk [vmem:[#allocation10] sm:$0xff] %vm976_vm1, %v2417_v1  ;;  %v2410_v61 = vmul.f32 %v2731_v56, %v2402_v2 }
0x10b7   : > { %v2418_v3 = vadd.f32 %v2732_v62, %v2410_v61 }
0x10b9   : > { %2420 = vst.msk [vmem:[#allocation10 + $0x8] sm:$0xff] %vm976_vm1, %v2418_v3 }
0x10ba PF: > { %s4103_s14 = sld [smem:[#allocation19_spill]]  ;;  %s3313_s22 = smov [#allocation10]  }
0x10bb   : > { %s2430_s30 = sshll.u32 %s3313_s22, 4  ;;  %s2431_s30 = int_to_ptr.vmem [resolvable:$true] %s2430_s30 }
0x10bc   : > { %s3210_s29 = scalar_lea.vmem %s2431_s30, 256  ;;  %p3217_p1 = scmp.lt.s32.totalorder %s2431_s30, %s2431_s30 }
0x10bd   : > { %p3211_p13 = scmp.ne.s32.totalorder %s2431_s30, %s3210_s29  ;;  %p3218_p2 = scmp.lt.s32.totalorder %s3210_s29, %s3210_s29 }
0x10bf   : > { %p3219_p5 = por %p3218_p2, %p3217_p1 }
0x10c0   : > { %p2978_p4 = scmp.eq.s32.totalorder %s4103_s14, 1 }
0x10c2   : > { %p3212_p3 = pnand %p3211_p13, %p2978_p4 }
0x10c4   : > { %p3213_p0 = pneg %p3212_p3 }
0x10c6   : > { %p3220_p11 = pnand %p3219_p5, %p3213_p0 }
0x10c8   : > { %3223 = shalt.err (!%p3220_p11)
}
0x10c9   : > { %s3314_s0 = smov 128   ;;  %s4104_s15 = sld [smem:[#allocation40_spill]] }
0x10cf   : > { %2956 = dma.vmem_to_hbm [thread:$0]  (%p2978_p4), %s2431_s30, 256, %s4104_s15, [#allocation5], %s3314_s0, %s3314_s0, %s3310_s1  }
0x10d0   : > { %3271 = dma.done.wait (%p2978_p4), [#allocation5], 256  }
0x10d1   : > { %3273 = vsyncadd (%p2978_p4), [#allocation5], 4294967040 }
0x10d2 PF: > { %s4105_s3 = sld [smem:[#allocation18_spill]] }
0x10d3   : > { %s4106_s1 = sld [smem:[#allocation15_spill]] }
0x10d4   : > { %s4107_s22 = sld [smem:[#allocation16_spill]] }
0x10d5   : > { %s4108_s23 = sld [smem:[#allocation21_spill]] }
0x10d6   : > { %s4109_s24 = sld [smem:[#allocation17_spill]] }
0x10d7   : > { %s4110_s2 = sld [smem:[#allocation20_spill]] }
0x10d8   : > { %s33_s25 = sadd.s32 1, %s4105_s3  }
0x10d9   : > { %p30_p10 = scmp.ge.s32.totalorder %s33_s25, 4  }
0x10db   :  { %32 = sbr.rel (!%p30_p10) target bundleno = 24 (0x18), region = 207 }
0x10e0   :  { %2446 = vsyncpa [#allocation4], 1 }
0x10e1   :  { %2448 = vsyncpa [#allocation4 + $0x1], 1 }
0x10e2   :  { %2449 = vsyncpa [#allocation7], 1 }
0x10e3   :  { %2450 = vsyncpa [#allocation5], 1 }
0x10e4   :  { %2452 = vsyncpa [#allocation5 + $0x1], 1 }

</bundles_post_ra>
